<compile_context>
chip_gen: v7x
topology: tpu7x:2x2x1
jax: 0.10.0
libtpu: 0.0.40
codegen_flags: <defaults>
</compile_context>

<pallas_src>
import functools

import jax
import jax.numpy as jnp
from jax import lax
from jax.experimental import pallas as pl
from jax.experimental.pallas import tpu as pltpu


# ---------------------------------------------------------------------------
# Single fused kernel: LSTM-mean -> coeff softmax -> all RGCN layers -> output
# ---------------------------------------------------------------------------
def _fused_temporal_rgcn_kernel(
    x_ref,           # (T, B, D)     time-major temporal embeddings
    wx_ref,          # (D, 4H)       fused input->gates weight,  gate order i|f|o|g
    wh_ref,          # (H, 4H)       fused hidden->gates weight, gate order i|f|o|g
    bl_ref,          # (1, 4H)       fused gate bias (b_ih + b_hh), order i|f|o|g
    sp_ref,          # (N, F)        spatial node embeddings
    adj_ref,         # (R*N, N)      row-stacked mean-normalized per-relation adjacency
    wrel_mid_ref,    # (Lmid*R, F, H) per-relation weights of middle layers
    wroot_mid_ref,   # (Lmid, F, H)   root weights of middle layers
    bmid_ref,        # (Lmid, 1, H)
    wrel_last_ref,   # (R, H, O)
    wroot_last_ref,  # (H, O)
    blast_ref,       # (1, O)
    out_ref,         # (N, F + Lmid*H + O)  concatenated layer outputs
    xg_ref,          # scratch VMEM (T, B, 4H): precomputed input gate pre-acts
    *,
    seq_len, hidden_dim, num_relations, num_nodes, num_mid_layers,
):
    H = hidden_dim
    R = num_relations
    N = num_nodes
    T = seq_len
    B = x_ref.shape[1]
    D = x_ref.shape[2]
    F = sp_ref.shape[1]

    # ---- 1. TemporalMatrixLSTM: LSTM over time, mean of hidden states -------
    # 1a. Hoisted input projection: one (T*B, D) @ (D, 4H) matmul + bias, off
    #     the serial critical path.
    x_all = x_ref[...].reshape(T * B, D)
    xg_ref[...] = (
        jnp.dot(x_all, wx_ref[...], preferred_element_type=jnp.float32)
        + bl_ref[...]
    ).reshape(T, B, 4 * H)

    wh = wh_ref[...]

    # 1b. Serial recurrence: only h @ W_hh + elementwise per step.
    #     Gate order i|f|o|g -> sigmoid on one contiguous 3H slice, tanh on H.
    def lstm_step(t, carry):
        h, c, acc = carry
        gates = xg_ref[t] + jnp.dot(h, wh, preferred_element_type=jnp.float32)
        sg = jax.nn.sigmoid(gates[:, 0:3 * H])
        i_g = sg[:, 0:H]
        f_g = sg[:, H:2 * H]
        o_g = sg[:, 2 * H:3 * H]
        g_g = jnp.tanh(gates[:, 3 * H:4 * H])
        c_new = f_g * c + i_g * g_g
        h_new = o_g * jnp.tanh(c_new)
        return h_new, c_new, acc + h_new

    z = jnp.zeros((B, H), jnp.float32)
    _, _, h_sum = lax.fori_loop(0, T, lstm_step, (z, z, z),
                                unroll=min(T, 8))
    tm = h_sum * (1.0 / T)                                            # (B, H)

    # ---- 2. temporal coefficients = softmax(spatial @ tm^T, axis=-1) --------
    spatial = sp_ref[...]                                             # (N, F)
    scores = lax.dot_general(spatial, tm, (((1,), (1,)), ((), ())),
                             preferred_element_type=jnp.float32)      # (N, B)
    scores = scores - jnp.max(scores, axis=-1, keepdims=True)
    e = jnp.exp(scores)
    coeff = e * pl.reciprocal(jnp.sum(e, axis=-1, keepdims=True), approx=True)

    # ---- 3. hoisted batched relation aggregation on the fixed input ---------
    # One (R*N, N) @ (N, F) matmul, shared by every middle layer.
    agg_s = jnp.dot(adj_ref[...], spatial,
                    preferred_element_type=jnp.float32)               # (R*N, F)
    agg_s3 = agg_s.reshape(R, N, F)                                   # (R, N, F)

    # ---- 4. middle layers: no lane-axis concat, direct output-slice store ---
    out_ref[:, 0:F] = spatial
    col = F

    wrel_mid = wrel_mid_ref[...]                                      # (Lmid*R, F, H)
    x = spatial
    for li in range(num_mid_layers):
        wrel_li = wrel_mid[li * R:(li + 1) * R]                       # (R, F, H)
        # sum_r (A_r @ spatial) @ W_r  as one batched contraction + cheap sum
        rel = lax.dot_general(agg_s3, wrel_li,
                              (((2,), (1,)), ((0,), (0,))),
                              preferred_element_type=jnp.float32)     # (R, N, H)
        zl = (jnp.dot(spatial, wroot_mid_ref[li],
                      preferred_element_type=jnp.float32)
              + bmid_ref[li]
              + jnp.sum(rel, axis=0))                                 # (N, H)
        x = jnp.tanh(zl * coeff)          # requires B == H (reference quirk)
        out_ref[:, col:col + H] = x
        col += H

    # ---- 5. final conv on the last middle-layer output ----------------------
    agg_f = jnp.dot(adj_ref[...], x, preferred_element_type=jnp.float32)
    agg_f3 = agg_f.reshape(R, N, H)
    rel_l = lax.dot_general(agg_f3, wrel_last_ref[...],
                            (((2,), (1,)), ((0,), (0,))),
                            preferred_element_type=jnp.float32)       # (R, N, O)
    x_last = (jnp.dot(x, wroot_last_ref[...],
                      preferred_element_type=jnp.float32)
              + blast_ref[...]
              + jnp.sum(rel_l, axis=0))                               # (N, O)
    O = x_last.shape[1]
    out_ref[:, col:col + O] = x_last


# ---------------------------------------------------------------------------
# Glue: per-relation mean-normalized adjacency from edge_index / edge_type.
# (data-dependent scatter; plain JAX, not a Pallas hot path)
# ---------------------------------------------------------------------------
def build_relation_adjacency(edge_index, edge_type, num_relations, num_nodes):
    src, tgt = edge_index[0], edge_index[1]
    adj = jnp.zeros((num_relations, num_nodes, num_nodes), jnp.float32)
    adj = adj.at[edge_type, tgt, src].add(1.0)
    deg = jnp.sum(adj, axis=2, keepdims=True)
    return jnp.where(deg > 0, adj / jnp.where(deg > 0, deg, 1.0), 0.0)


# ---------------------------------------------------------------------------
# Full TemporalRGCN forward (single pallas_call)
# ---------------------------------------------------------------------------
def temporal_rgcn_forward(params, spatial, edge_index, edge_type, temporal,
                          *, num_layers, num_relations):
    B, T, _ = temporal.shape
    N, F = spatial.shape
    H = params["lstm_wh"].shape[0]
    assert num_layers >= 3, "reference forward needs >= 1 middle layer"
    assert F == H, "reference implicitly requires input_dim == hidden_dim"
    assert B == H, "reference gating x*coeff implicitly requires batch == hidden"

    # Parameter / layout prep (traced once, outside the kernel).
    x_tbd = jnp.transpose(temporal, (1, 0, 2))                 # (T, B, D)
    adj = build_relation_adjacency(edge_index, edge_type, num_relations, N)
    adj_rows = adj.reshape(num_relations * N, N)               # (R*N, N)

    # Reorder LSTM gate columns i|f|g|o -> i|f|o|g so all sigmoid gates are
    # contiguous inside the kernel's serial loop.
    def reorder_gates(w):
        return jnp.concatenate(
            [w[..., 0:2 * H], w[..., 3 * H:4 * H], w[..., 2 * H:3 * H]],
            axis=-1)

    wx = reorder_gates(params["lstm_wx"])                      # (D, 4H)
    wh = reorder_gates(params["lstm_wh"])                      # (H, 4H)
    bl = reorder_gates(params["lstm_b"])                       # (1, 4H)

    # RGCN weights: keep per-relation weights separate (no stacked concat).
    mids = params["convs"][1:num_layers - 1]
    w_rel_mid = jnp.concatenate([wr for (wr, _, _) in mids], axis=0)  # (Lmid*R, F, H)
    w_root_mid = jnp.stack([wroot for (_, wroot, _) in mids])         # (Lmid, F, H)
    b_mid = jnp.stack([bb for (_, _, bb) in mids])                    # (Lmid, 1, H)
    w_rel_last, w_root_last, b_last = params["convs"][-1]             # (R,H,O),(H,O),(1,O)

    out_dim = w_root_last.shape[-1]
    num_mid = num_layers - 2
    total_cols = F + num_mid * H + out_dim

    kernel = functools.partial(
        _fused_temporal_rgcn_kernel,
        seq_len=T, hidden_dim=H, num_relations=num_relations,
        num_nodes=N, num_mid_layers=num_mid)

    return pl.pallas_call(
        kernel,
        out_shape=jax.ShapeDtypeStruct((N, total_cols), jnp.float32),
        scratch_shapes=[pltpu.VMEM((T, B, 4 * H), jnp.float32)],
    )(x_tbd, wx, wh, bl, spatial, adj_rows,
      w_rel_mid, w_root_mid, b_mid, w_rel_last, w_root_last, b_last)


# ---------------------------------------------------------------------------
# Pure-JAX reference (structural check)
# ---------------------------------------------------------------------------
def _reference_forward(params, spatial, edge_index, edge_type, temporal,
                       *, num_layers, num_relations):
    B, _, _ = temporal.shape
    H = params["lstm_wh"].shape[0]
    wx, wh, b = params["lstm_wx"], params["lstm_wh"], params["lstm_b"]

    def step(carry, x_t):
        h, c = carry
        g = x_t @ wx + h @ wh + b
        i = jax.nn.sigmoid(g[:, :H]); f = jax.nn.sigmoid(g[:, H:2 * H])
        gg = jnp.tanh(g[:, 2 * H:3 * H]); o = jax.nn.sigmoid(g[:, 3 * H:])
        c = f * c + i * gg
        h = o * jnp.tanh(c)
        return (h, c), h

    x_tbd = jnp.transpose(temporal, (1, 0, 2))
    (_, _), hs = lax.scan(step, (jnp.zeros((B, H)), jnp.zeros((B, H))), x_tbd)
    tm = jnp.mean(hs, axis=0)

    coeff = jax.nn.softmax(spatial @ tm.T, axis=-1)
    adj = build_relation_adjacency(edge_index, edge_type, num_relations,
                                   spatial.shape[0])

    def conv(x, wrel, wroot, bias):
        out = x @ wroot + bias
        for r in range(num_relations):
            out = out + adj[r] @ x @ wrel[r]
        return out

    outs = [spatial]
    x = spatial
    for i in range(1, num_layers - 1):
        x = jnp.tanh(conv(spatial, *params["convs"][i]) * coeff)
        outs.append(x)
    x = conv(x, *params["convs"][-1])
    outs.append(x)
    return jnp.concatenate(outs, axis=-1)


# ---------------------------------------------------------------------------
if __name__ == "__main__":
    # Small deterministic shapes. The reference broadcasts (N,hidden)*(N,batch)
    # and matmuls spatial(.,H) @ tm(B,H).T, so it needs batch == hidden and
    # spatial features == hidden.
    input_dim = hidden_dim = 8
    output_dim = 8
    num_relations = 3
    num_layers = 3
    batch_size = hidden_dim          # = 8
    seq_len = 8
    num_nodes = 16
    num_edges = 48

    key = jax.random.PRNGKey(0)
    k = jax.random.split(key, 10)

    spatial = jax.random.normal(k[0], (num_nodes, hidden_dim), jnp.float32)
    temporal = jax.random.normal(k[1], (batch_size, seq_len, hidden_dim),
                                 jnp.float32)
    edge_index = jax.random.randint(k[2], (2, num_edges), 0, num_nodes,
                                    dtype=jnp.int32)
    edge_type = jax.random.randint(k[3], (num_edges,), 0, num_relations,
                                   dtype=jnp.int32)

    # LSTM params in PyTorch layout (4H, D)/(4H, H), gate order (i, f, g, o),
    # converted to fused (D, 4H)/(H, 4H) kernels + single (1, 4H) bias.
    w_ih = 0.1 * jax.random.normal(k[4], (4 * hidden_dim, hidden_dim), jnp.float32)
    w_hh = 0.1 * jax.random.normal(k[5], (4 * hidden_dim, hidden_dim), jnp.float32)
    b_ih = 0.1 * jax.random.normal(k[6], (4 * hidden_dim,), jnp.float32)
    b_hh = 0.1 * jax.random.normal(k[7], (4 * hidden_dim,), jnp.float32)
    lstm_wx = w_ih.T                                        # (D, 4H)
    lstm_wh = w_hh.T                                        # (H, 4H)
    lstm_b = (b_ih + b_hh).reshape(1, 4 * hidden_dim)       # (1, 4H)

    # RGCNConv parameters (per-relation weights, root weight, bias).
    dims = ([(input_dim, hidden_dim)]
            + [(hidden_dim, hidden_dim)] * (num_layers - 2)
            + [(hidden_dim, output_dim)])
    ck = jax.random.split(k[8], 3 * num_layers)
    convs = []
    for li, (din, dout) in enumerate(dims):
        wrel = 0.3 * jax.random.normal(ck[3 * li], (num_relations, din, dout),
                                       jnp.float32)
        wroot = 0.3 * jax.random.normal(ck[3 * li + 1], (din, dout), jnp.float32)
        bias = 0.1 * jax.random.normal(ck[3 * li + 2], (1, dout), jnp.float32)
        convs.append((wrel, wroot, bias))

    params = {"lstm_wx": lstm_wx, "lstm_wh": lstm_wh, "lstm_b": lstm_b,
              "convs": convs}

    out = temporal_rgcn_forward(params, spatial, edge_index, edge_type, temporal,
                                num_layers=num_layers,
                                num_relations=num_relations)
    out = jax.block_until_ready(out)

    expected_cols = hidden_dim * (num_layers - 1) + output_dim
    assert out.shape == (num_nodes, expected_cols), out.shape
    assert bool(jnp.all(jnp.isfinite(out)))

    # Structural-parity check against a pure-JAX reference. Tolerance tightened
    # from 5e-2 to 1e-2; it cannot go to ~1e-4 because the kernel intentionally
    # normalizes the softmax with the EUP approximate reciprocal
    # (pl.reciprocal(approx=True)), which bounds achievable bitwise parity.
    ref = _reference_forward(params, spatial, edge_index, edge_type, temporal,
                             num_layers=num_layers, num_relations=num_relations)
    ref = jax.block_until_ready(ref)
    max_err = float(jnp.max(jnp.abs(out - ref)))
    assert bool(jnp.allclose(out, ref, atol=1e-2, rtol=1e-2)), max_err

    print("KERNEL_OK")
</pallas_src>

<mosaic_0001>
module attributes {stable_mosaic.version = 11 : i64} {
  func.func @_fused_temporal_rgcn_kernel(%arg0: memref<8x8x8xf32, #tpu.memory_space<vmem>>, %arg1: memref<8x32xf32, #tpu.memory_space<vmem>>, %arg2: memref<8x32xf32, #tpu.memory_space<vmem>>, %arg3: memref<1x32xf32, #tpu.memory_space<vmem>>, %arg4: memref<16x8xf32, #tpu.memory_space<vmem>>, %arg5: memref<48x16xf32, #tpu.memory_space<vmem>>, %arg6: memref<3x8x8xf32, #tpu.memory_space<vmem>>, %arg7: memref<1x8x8xf32, #tpu.memory_space<vmem>>, %arg8: memref<1x1x8xf32, #tpu.memory_space<vmem>>, %arg9: memref<3x8x8xf32, #tpu.memory_space<vmem>>, %arg10: memref<8x8xf32, #tpu.memory_space<vmem>>, %arg11: memref<1x8xf32, #tpu.memory_space<vmem>>, %arg12: memref<16x24xf32, #tpu.memory_space<vmem>>, %arg13: memref<8x8x32xf32, #tpu.memory_space<vmem>>) attributes {dimension_semantics = [], scalar_prefetch = 0 : i64, scratch_operands = 1 : i64, tpu.core_type = #tpu.core_type<tc>} {
    %c0 = arith.constant 0 : index
    %c0_0 = arith.constant 0 : index
    %c0_1 = arith.constant 0 : index
    %0 = vector.load %arg0[%c0, %c0_0, %c0_1] : memref<8x8x8xf32, #tpu.memory_space<vmem>>, vector<8x8x8xf32>
    %1 = vector.shape_cast %0 : vector<8x8x8xf32> to vector<64x8xf32>
    %c0_2 = arith.constant 0 : index
    %c0_3 = arith.constant 0 : index
    %2 = vector.load %arg1[%c0_2, %c0_3] : memref<8x32xf32, #tpu.memory_space<vmem>>, vector<8x32xf32>
    %cst = arith.constant dense<0.000000e+00> : vector<64x32xf32>
    %3 = tpu.matmul %1, %2, %cst {dimension_numbers = #tpu.dot_dimension_numbers<[1], [0], [0], [1], [0, 0, 1, 1], [], []>} : vector<64x8xf32>, vector<8x32xf32>, vector<64x32xf32> -> vector<64x32xf32>
    %c0_4 = arith.constant 0 : index
    %c0_5 = arith.constant 0 : index
    %4 = vector.load %arg3[%c0_4, %c0_5] : memref<1x32xf32, #tpu.memory_space<vmem>>, vector<1x32xf32>
    %5 = vector.broadcast %4 : vector<1x32xf32> to vector<64x32xf32>
    %6 = arith.addf %3, %5 : vector<64x32xf32>
    %7 = vector.shape_cast %6 : vector<64x32xf32> to vector<8x8x32xf32>
    %c0_6 = arith.constant 0 : index
    %c0_7 = arith.constant 0 : index
    %c0_8 = arith.constant 0 : index
    %8 = vector.load %arg13[%c0_6, %c0_7, %c0_8] : memref<8x8x32xf32, #tpu.memory_space<vmem>>, vector<8x8x32xf32>
    tpu.vector_store %arg13[%c0_6, %c0_7, %c0_8], %7 {strides = array<i32>} : memref<8x8x32xf32, #tpu.memory_space<vmem>>, vector<8x8x32xf32>,
    %c0_9 = arith.constant 0 : index
    %c0_10 = arith.constant 0 : index
    %9 = vector.load %arg2[%c0_9, %c0_10] : memref<8x32xf32, #tpu.memory_space<vmem>>, vector<8x32xf32>
    %cst_11 = arith.constant 0.000000e+00 : f32
    %10 = vector.broadcast %cst_11 : f32 to vector<8x8xf32>
    %c0_i32 = arith.constant 0 : i32
    %11 = arith.index_cast %c0_i32 : i32 to index
    %c0_12 = arith.constant 0 : index
    %c0_13 = arith.constant 0 : index
    %12 = vector.load %arg13[%11, %c0_12, %c0_13] : memref<8x8x32xf32, #tpu.memory_space<vmem>>, vector<1x8x32xf32>
    %13 = vector.shape_cast %12 : vector<1x8x32xf32> to vector<8x32xf32>
    %cst_14 = arith.constant dense<0.000000e+00> : vector<8x32xf32>
    %14 = tpu.matmul %10, %9, %cst_14 {dimension_numbers = #tpu.dot_dimension_numbers<[1], [0], [0], [1], [0, 0, 1, 1], [], []>} : vector<8x8xf32>, vector<8x32xf32>, vector<8x32xf32> -> vector<8x32xf32>
    %15 = arith.addf %13, %14 : vector<8x32xf32>
    %16 = vector.extract_strided_slice %15 {offsets = [0, 0], sizes = [8, 24], strides = [1, 1]} : vector<8x32xf32> to vector<8x24xf32>
    %17 = arith.negf %16 : vector<8x24xf32>
    %18 = math.exp %17 : vector<8x24xf32>
    %cst_15 = arith.constant 1.000000e+00 : f32
    %19 = vector.broadcast %cst_15 : f32 to vector<8x24xf32>
    %20 = arith.addf %19, %18 : vector<8x24xf32>
    %21 = arith.divf %19, %20 : vector<8x24xf32>
    %22 = vector.extract_strided_slice %21 {offsets = [0, 0], sizes = [8, 8], strides = [1, 1]} : vector<8x24xf32> to vector<8x8xf32>
    %23 = vector.extract_strided_slice %21 {offsets = [0, 8], sizes = [8, 8], strides = [1, 1]} : vector<8x24xf32> to vector<8x8xf32>
    %24 = vector.extract_strided_slice %21 {offsets = [0, 16], sizes = [8, 8], strides = [1, 1]} : vector<8x24xf32> to vector<8x8xf32>
    %25 = vector.extract_strided_slice %15 {offsets = [0, 24], sizes = [8, 8], strides = [1, 1]} : vector<8x32xf32> to vector<8x8xf32>
    %26 = math.tanh %25 : vector<8x8xf32>
    %27 = arith.mulf %23, %10 : vector<8x8xf32>
    %28 = arith.mulf %22, %26 : vector<8x8xf32>
    %29 = arith.addf %27, %28 : vector<8x8xf32>
    %30 = math.tanh %29 : vector<8x8xf32>
    %31 = arith.mulf %24, %30 : vector<8x8xf32>
    %32 = arith.addf %10, %31 : vector<8x8xf32>
    %c1_i32 = arith.constant 1 : i32
    %33 = arith.index_cast %c1_i32 : i32 to index
    %c0_16 = arith.constant 0 : index
    %c0_17 = arith.constant 0 : index
    %34 = vector.load %arg13[%33, %c0_16, %c0_17] : memref<8x8x32xf32, #tpu.memory_space<vmem>>, vector<1x8x32xf32>
    %35 = vector.shape_cast %34 : vector<1x8x32xf32> to vector<8x32xf32>
    %cst_18 = arith.constant dense<0.000000e+00> : vector<8x32xf32>
    %36 = tpu.matmul %31, %9, %cst_18 {dimension_numbers = #tpu.dot_dimension_numbers<[1], [0], [0], [1], [0, 0, 1, 1], [], []>} : vector<8x8xf32>, vector<8x32xf32>, vector<8x32xf32> -> vector<8x32xf32>
    %37 = arith.addf %35, %36 : vector<8x32xf32>
    %38 = vector.extract_strided_slice %37 {offsets = [0, 0], sizes = [8, 24], strides = [1, 1]} : vector<8x32xf32> to vector<8x24xf32>
    %39 = arith.negf %38 : vector<8x24xf32>
    %40 = math.exp %39 : vector<8x24xf32>
    %cst_19 = arith.constant 1.000000e+00 : f32
    %41 = vector.broadcast %cst_19 : f32 to vector<8x24xf32>
    %42 = arith.addf %41, %40 : vector<8x24xf32>
    %43 = arith.divf %41, %42 : vector<8x24xf32>
    %44 = vector.extract_strided_slice %43 {offsets = [0, 0], sizes = [8, 8], strides = [1, 1]} : vector<8x24xf32> to vector<8x8xf32>
    %45 = vector.extract_strided_slice %43 {offsets = [0, 8], sizes = [8, 8], strides = [1, 1]} : vector<8x24xf32> to vector<8x8xf32>
    %46 = vector.extract_strided_slice %43 {offsets = [0, 16], sizes = [8, 8], strides = [1, 1]} : vector<8x24xf32> to vector<8x8xf32>
    %47 = vector.extract_strided_slice %37 {offsets = [0, 24], sizes = [8, 8], strides = [1, 1]} : vector<8x32xf32> to vector<8x8xf32>
    %48 = math.tanh %47 : vector<8x8xf32>
    %49 = arith.mulf %45, %29 : vector<8x8xf32>
    %50 = arith.mulf %44, %48 : vector<8x8xf32>
    %51 = arith.addf %49, %50 : vector<8x8xf32>
    %52 = math.tanh %51 : vector<8x8xf32>
    %53 = arith.mulf %46, %52 : vector<8x8xf32>
    %54 = arith.addf %32, %53 : vector<8x8xf32>
    %c2_i32 = arith.constant 2 : i32
    %55 = arith.index_cast %c2_i32 : i32 to index
    %c0_20 = arith.constant 0 : index
    %c0_21 = arith.constant 0 : index
    %56 = vector.load %arg13[%55, %c0_20, %c0_21] : memref<8x8x32xf32, #tpu.memory_space<vmem>>, vector<1x8x32xf32>
    %57 = vector.shape_cast %56 : vector<1x8x32xf32> to vector<8x32xf32>
    %cst_22 = arith.constant dense<0.000000e+00> : vector<8x32xf32>
    %58 = tpu.matmul %53, %9, %cst_22 {dimension_numbers = #tpu.dot_dimension_numbers<[1], [0], [0], [1], [0, 0, 1, 1], [], []>} : vector<8x8xf32>, vector<8x32xf32>, vector<8x32xf32> -> vector<8x32xf32>
    %59 = arith.addf %57, %58 : vector<8x32xf32>
    %60 = vector.extract_strided_slice %59 {offsets = [0, 0], sizes = [8, 24], strides = [1, 1]} : vector<8x32xf32> to vector<8x24xf32>
    %61 = arith.negf %60 : vector<8x24xf32>
    %62 = math.exp %61 : vector<8x24xf32>
    %cst_23 = arith.constant 1.000000e+00 : f32
    %63 = vector.broadcast %cst_23 : f32 to vector<8x24xf32>
    %64 = arith.addf %63, %62 : vector<8x24xf32>
    %65 = arith.divf %63, %64 : vector<8x24xf32>
    %66 = vector.extract_strided_slice %65 {offsets = [0, 0], sizes = [8, 8], strides = [1, 1]} : vector<8x24xf32> to vector<8x8xf32>
    %67 = vector.extract_strided_slice %65 {offsets = [0, 8], sizes = [8, 8], strides = [1, 1]} : vector<8x24xf32> to vector<8x8xf32>
    %68 = vector.extract_strided_slice %65 {offsets = [0, 16], sizes = [8, 8], strides = [1, 1]} : vector<8x24xf32> to vector<8x8xf32>
    %69 = vector.extract_strided_slice %59 {offsets = [0, 24], sizes = [8, 8], strides = [1, 1]} : vector<8x32xf32> to vector<8x8xf32>
    %70 = math.tanh %69 : vector<8x8xf32>
    %71 = arith.mulf %67, %51 : vector<8x8xf32>
    %72 = arith.mulf %66, %70 : vector<8x8xf32>
    %73 = arith.addf %71, %72 : vector<8x8xf32>
    %74 = math.tanh %73 : vector<8x8xf32>
    %75 = arith.mulf %68, %74 : vector<8x8xf32>
    %76 = arith.addf %54, %75 : vector<8x8xf32>
    %c3_i32 = arith.constant 3 : i32
    %77 = arith.index_cast %c3_i32 : i32 to index
    %c0_24 = arith.constant 0 : index
    %c0_25 = arith.constant 0 : index
    %78 = vector.load %arg13[%77, %c0_24, %c0_25] : memref<8x8x32xf32, #tpu.memory_space<vmem>>, vector<1x8x32xf32>
    %79 = vector.shape_cast %78 : vector<1x8x32xf32> to vector<8x32xf32>
    %cst_26 = arith.constant dense<0.000000e+00> : vector<8x32xf32>
    %80 = tpu.matmul %75, %9, %cst_26 {dimension_numbers = #tpu.dot_dimension_numbers<[1], [0], [0], [1], [0, 0, 1, 1], [], []>} : vector<8x8xf32>, vector<8x32xf32>, vector<8x32xf32> -> vector<8x32xf32>
    %81 = arith.addf %79, %80 : vector<8x32xf32>
    %82 = vector.extract_strided_slice %81 {offsets = [0, 0], sizes = [8, 24], strides = [1, 1]} : vector<8x32xf32> to vector<8x24xf32>
    %83 = arith.negf %82 : vector<8x24xf32>
    %84 = math.exp %83 : vector<8x24xf32>
    %cst_27 = arith.constant 1.000000e+00 : f32
    %85 = vector.broadcast %cst_27 : f32 to vector<8x24xf32>
    %86 = arith.addf %85, %84 : vector<8x24xf32>
    %87 = arith.divf %85, %86 : vector<8x24xf32>
    %88 = vector.extract_strided_slice %87 {offsets = [0, 0], sizes = [8, 8], strides = [1, 1]} : vector<8x24xf32> to vector<8x8xf32>
    %89 = vector.extract_strided_slice %87 {offsets = [0, 8], sizes = [8, 8], strides = [1, 1]} : vector<8x24xf32> to vector<8x8xf32>
    %90 = vector.extract_strided_slice %87 {offsets = [0, 16], sizes = [8, 8], strides = [1, 1]} : vector<8x24xf32> to vector<8x8xf32>
    %91 = vector.extract_strided_slice %81 {offsets = [0, 24], sizes = [8, 8], strides = [1, 1]} : vector<8x32xf32> to vector<8x8xf32>
    %92 = math.tanh %91 : vector<8x8xf32>
    %93 = arith.mulf %89, %73 : vector<8x8xf32>
    %94 = arith.mulf %88, %92 : vector<8x8xf32>
    %95 = arith.addf %93, %94 : vector<8x8xf32>
    %96 = math.tanh %95 : vector<8x8xf32>
    %97 = arith.mulf %90, %96 : vector<8x8xf32>
    %98 = arith.addf %76, %97 : vector<8x8xf32>
    %c4_i32 = arith.constant 4 : i32
    %99 = arith.index_cast %c4_i32 : i32 to index
    %c0_28 = arith.constant 0 : index
    %c0_29 = arith.constant 0 : index
    %100 = vector.load %arg13[%99, %c0_28, %c0_29] : memref<8x8x32xf32, #tpu.memory_space<vmem>>, vector<1x8x32xf32>
    %101 = vector.shape_cast %100 : vector<1x8x32xf32> to vector<8x32xf32>
    %cst_30 = arith.constant dense<0.000000e+00> : vector<8x32xf32>
    %102 = tpu.matmul %97, %9, %cst_30 {dimension_numbers = #tpu.dot_dimension_numbers<[1], [0], [0], [1], [0, 0, 1, 1], [], []>} : vector<8x8xf32>, vector<8x32xf32>, vector<8x32xf32> -> vector<8x32xf32>
    %103 = arith.addf %101, %102 : vector<8x32xf32>
    %104 = vector.extract_strided_slice %103 {offsets = [0, 0], sizes = [8, 24], strides = [1, 1]} : vector<8x32xf32> to vector<8x24xf32>
    %105 = arith.negf %104 : vector<8x24xf32>
    %106 = math.exp %105 : vector<8x24xf32>
    %cst_31 = arith.constant 1.000000e+00 : f32
    %107 = vector.broadcast %cst_31 : f32 to vector<8x24xf32>
    %108 = arith.addf %107, %106 : vector<8x24xf32>
    %109 = arith.divf %107, %108 : vector<8x24xf32>
    %110 = vector.extract_strided_slice %109 {offsets = [0, 0], sizes = [8, 8], strides = [1, 1]} : vector<8x24xf32> to vector<8x8xf32>
    %111 = vector.extract_strided_slice %109 {offsets = [0, 8], sizes = [8, 8], strides = [1, 1]} : vector<8x24xf32> to vector<8x8xf32>
    %112 = vector.extract_strided_slice %109 {offsets = [0, 16], sizes = [8, 8], strides = [1, 1]} : vector<8x24xf32> to vector<8x8xf32>
    %113 = vector.extract_strided_slice %103 {offsets = [0, 24], sizes = [8, 8], strides = [1, 1]} : vector<8x32xf32> to vector<8x8xf32>
    %114 = math.tanh %113 : vector<8x8xf32>
    %115 = arith.mulf %111, %95 : vector<8x8xf32>
    %116 = arith.mulf %110, %114 : vector<8x8xf32>
    %117 = arith.addf %115, %116 : vector<8x8xf32>
    %118 = math.tanh %117 : vector<8x8xf32>
    %119 = arith.mulf %112, %118 : vector<8x8xf32>
    %120 = arith.addf %98, %119 : vector<8x8xf32>
    %c5_i32 = arith.constant 5 : i32
    %121 = arith.index_cast %c5_i32 : i32 to index
    %c0_32 = arith.constant 0 : index
    %c0_33 = arith.constant 0 : index
    %122 = vector.load %arg13[%121, %c0_32, %c0_33] : memref<8x8x32xf32, #tpu.memory_space<vmem>>, vector<1x8x32xf32>
    %123 = vector.shape_cast %122 : vector<1x8x32xf32> to vector<8x32xf32>
    %cst_34 = arith.constant dense<0.000000e+00> : vector<8x32xf32>
    %124 = tpu.matmul %119, %9, %cst_34 {dimension_numbers = #tpu.dot_dimension_numbers<[1], [0], [0], [1], [0, 0, 1, 1], [], []>} : vector<8x8xf32>, vector<8x32xf32>, vector<8x32xf32> -> vector<8x32xf32>
    %125 = arith.addf %123, %124 : vector<8x32xf32>
    %126 = vector.extract_strided_slice %125 {offsets = [0, 0], sizes = [8, 24], strides = [1, 1]} : vector<8x32xf32> to vector<8x24xf32>
    %127 = arith.negf %126 : vector<8x24xf32>
    %128 = math.exp %127 : vector<8x24xf32>
    %cst_35 = arith.constant 1.000000e+00 : f32
    %129 = vector.broadcast %cst_35 : f32 to vector<8x24xf32>
    %130 = arith.addf %129, %128 : vector<8x24xf32>
    %131 = arith.divf %129, %130 : vector<8x24xf32>
    %132 = vector.extract_strided_slice %131 {offsets = [0, 0], sizes = [8, 8], strides = [1, 1]} : vector<8x24xf32> to vector<8x8xf32>
    %133 = vector.extract_strided_slice %131 {offsets = [0, 8], sizes = [8, 8], strides = [1, 1]} : vector<8x24xf32> to vector<8x8xf32>
    %134 = vector.extract_strided_slice %131 {offsets = [0, 16], sizes = [8, 8], strides = [1, 1]} : vector<8x24xf32> to vector<8x8xf32>
    %135 = vector.extract_strided_slice %125 {offsets = [0, 24], sizes = [8, 8], strides = [1, 1]} : vector<8x32xf32> to vector<8x8xf32>
    %136 = math.tanh %135 : vector<8x8xf32>
    %137 = arith.mulf %133, %117 : vector<8x8xf32>
    %138 = arith.mulf %132, %136 : vector<8x8xf32>
    %139 = arith.addf %137, %138 : vector<8x8xf32>
    %140 = math.tanh %139 : vector<8x8xf32>
    %141 = arith.mulf %134, %140 : vector<8x8xf32>
    %142 = arith.addf %120, %141 : vector<8x8xf32>
    %c6_i32 = arith.constant 6 : i32
    %143 = arith.index_cast %c6_i32 : i32 to index
    %c0_36 = arith.constant 0 : index
    %c0_37 = arith.constant 0 : index
    %144 = vector.load %arg13[%143, %c0_36, %c0_37] : memref<8x8x32xf32, #tpu.memory_space<vmem>>, vector<1x8x32xf32>
    %145 = vector.shape_cast %144 : vector<1x8x32xf32> to vector<8x32xf32>
    %cst_38 = arith.constant dense<0.000000e+00> : vector<8x32xf32>
    %146 = tpu.matmul %141, %9, %cst_38 {dimension_numbers = #tpu.dot_dimension_numbers<[1], [0], [0], [1], [0, 0, 1, 1], [], []>} : vector<8x8xf32>, vector<8x32xf32>, vector<8x32xf32> -> vector<8x32xf32>
    %147 = arith.addf %145, %146 : vector<8x32xf32>
    %148 = vector.extract_strided_slice %147 {offsets = [0, 0], sizes = [8, 24], strides = [1, 1]} : vector<8x32xf32> to vector<8x24xf32>
    %149 = arith.negf %148 : vector<8x24xf32>
    %150 = math.exp %149 : vector<8x24xf32>
    %cst_39 = arith.constant 1.000000e+00 : f32
    %151 = vector.broadcast %cst_39 : f32 to vector<8x24xf32>
    %152 = arith.addf %151, %150 : vector<8x24xf32>
    %153 = arith.divf %151, %152 : vector<8x24xf32>
    %154 = vector.extract_strided_slice %153 {offsets = [0, 0], sizes = [8, 8], strides = [1, 1]} : vector<8x24xf32> to vector<8x8xf32>
    %155 = vector.extract_strided_slice %153 {offsets = [0, 8], sizes = [8, 8], strides = [1, 1]} : vector<8x24xf32> to vector<8x8xf32>
    %156 = vector.extract_strided_slice %153 {offsets = [0, 16], sizes = [8, 8], strides = [1, 1]} : vector<8x24xf32> to vector<8x8xf32>
    %157 = vector.extract_strided_slice %147 {offsets = [0, 24], sizes = [8, 8], strides = [1, 1]} : vector<8x32xf32> to vector<8x8xf32>
    %158 = math.tanh %157 : vector<8x8xf32>
    %159 = arith.mulf %155, %139 : vector<8x8xf32>
    %160 = arith.mulf %154, %158 : vector<8x8xf32>
    %161 = arith.addf %159, %160 : vector<8x8xf32>
    %162 = math.tanh %161 : vector<8x8xf32>
    %163 = arith.mulf %156, %162 : vector<8x8xf32>
    %164 = arith.addf %142, %163 : vector<8x8xf32>
    %c7_i32 = arith.constant 7 : i32
    %165 = arith.index_cast %c7_i32 : i32 to index
    %c0_40 = arith.constant 0 : index
    %c0_41 = arith.constant 0 : index
    %166 = vector.load %arg13[%165, %c0_40, %c0_41] : memref<8x8x32xf32, #tpu.memory_space<vmem>>, vector<1x8x32xf32>
    %167 = vector.shape_cast %166 : vector<1x8x32xf32> to vector<8x32xf32>
    %cst_42 = arith.constant dense<0.000000e+00> : vector<8x32xf32>
    %168 = tpu.matmul %163, %9, %cst_42 {dimension_numbers = #tpu.dot_dimension_numbers<[1], [0], [0], [1], [0, 0, 1, 1], [], []>} : vector<8x8xf32>, vector<8x32xf32>, vector<8x32xf32> -> vector<8x32xf32>
    %169 = arith.addf %167, %168 : vector<8x32xf32>
    %170 = vector.extract_strided_slice %169 {offsets = [0, 0], sizes = [8, 24], strides = [1, 1]} : vector<8x32xf32> to vector<8x24xf32>
    %171 = arith.negf %170 : vector<8x24xf32>
    %172 = math.exp %171 : vector<8x24xf32>
    %cst_43 = arith.constant 1.000000e+00 : f32
    %173 = vector.broadcast %cst_43 : f32 to vector<8x24xf32>
    %174 = arith.addf %173, %172 : vector<8x24xf32>
    %175 = arith.divf %173, %174 : vector<8x24xf32>
    %176 = vector.extract_strided_slice %175 {offsets = [0, 0], sizes = [8, 8], strides = [1, 1]} : vector<8x24xf32> to vector<8x8xf32>
    %177 = vector.extract_strided_slice %175 {offsets = [0, 8], sizes = [8, 8], strides = [1, 1]} : vector<8x24xf32> to vector<8x8xf32>
    %178 = vector.extract_strided_slice %175 {offsets = [0, 16], sizes = [8, 8], strides = [1, 1]} : vector<8x24xf32> to vector<8x8xf32>
    %179 = vector.extract_strided_slice %169 {offsets = [0, 24], sizes = [8, 8], strides = [1, 1]} : vector<8x32xf32> to vector<8x8xf32>
    %180 = math.tanh %179 : vector<8x8xf32>
    %181 = arith.mulf %177, %161 : vector<8x8xf32>
    %182 = arith.mulf %176, %180 : vector<8x8xf32>
    %183 = arith.addf %181, %182 : vector<8x8xf32>
    %184 = math.tanh %183 : vector<8x8xf32>
    %185 = arith.mulf %178, %184 : vector<8x8xf32>
    %186 = arith.addf %164, %185 : vector<8x8xf32>
    %c8_i32 = arith.constant 8 : i32
    %cst_44 = arith.constant 1.250000e-01 : f32
    %187 = vector.broadcast %cst_44 : f32 to vector<8x8xf32>
    %188 = arith.mulf %186, %187 : vector<8x8xf32>
    %c0_45 = arith.constant 0 : index
    %c0_46 = arith.constant 0 : index
    %189 = vector.load %arg4[%c0_45, %c0_46] : memref<16x8xf32, #tpu.memory_space<vmem>>, vector<16x8xf32>
    %cst_47 = arith.constant dense<0.000000e+00> : vector<16x8xf32>
    %190 = tpu.matmul %189, %188, %cst_47 {dimension_numbers = #tpu.dot_dimension_numbers<[1], [1], [0], [0], [0, 0, 1, 0], [], []>} : vector<16x8xf32>, vector<8x8xf32>, vector<16x8xf32> -> vector<16x8xf32>
    %cst_48 = arith.constant dense<0xFF800000> : vector<16xf32>
    %191 = vector.multi_reduction <maximumf>, %190, %cst_48 [1] : vector<16x8xf32> to vector<16xf32>
    %192 = vector.shape_cast %191 : vector<16xf32> to vector<16x1xf32>
    %193 = vector.broadcast %192 : vector<16x1xf32> to vector<16x8xf32>
    %194 = arith.subf %190, %193 : vector<16x8xf32>
    %195 = math.exp %194 : vector<16x8xf32>
    %cst_49 = arith.constant dense<0.000000e+00> : vector<16xf32>
    %196 = vector.multi_reduction <add>, %195, %cst_49 [1] : vector<16x8xf32> to vector<16xf32>
    %197 = vector.shape_cast %196 : vector<16xf32> to vector<16x1xf32>
    %198 = tpu.reciprocal %197 {approx = true} : vector<16x1xf32> -> vector<16x1xf32>
    %199 = vector.broadcast %198 : vector<16x1xf32> to vector<16x8xf32>
    %200 = arith.mulf %195, %199 : vector<16x8xf32>
    %c0_50 = arith.constant 0 : index
    %c0_51 = arith.constant 0 : index
    %201 = vector.load %arg5[%c0_50, %c0_51] : memref<48x16xf32, #tpu.memory_space<vmem>>, vector<48x16xf32>
    %cst_52 = arith.constant dense<0.000000e+00> : vector<48x8xf32>
    %202 = tpu.matmul %201, %189, %cst_52 {dimension_numbers = #tpu.dot_dimension_numbers<[1], [0], [0], [1], [0, 0, 1, 1], [], []>} : vector<48x16xf32>, vector<16x8xf32>, vector<48x8xf32> -> vector<48x8xf32>
    %203 = vector.shape_cast %202 : vector<48x8xf32> to vector<3x16x8xf32>
    %c0_53 = arith.constant 0 : index
    %c0_54 = arith.constant 0 : index
    %204 = vector.load %arg12[%c0_53, %c0_54] : memref<16x24xf32, #tpu.memory_space<vmem>>, vector<16x8xf32>
    tpu.vector_store %arg12[%c0_53, %c0_54], %189 {strides = array<i32>} : memref<16x24xf32, #tpu.memory_space<vmem>>, vector<16x8xf32>,
    %c0_55 = arith.constant 0 : index
    %c0_56 = arith.constant 0 : index
    %c0_57 = arith.constant 0 : index
    %205 = vector.load %arg6[%c0_55, %c0_56, %c0_57] : memref<3x8x8xf32, #tpu.memory_space<vmem>>, vector<3x8x8xf32>
    %cst_58 = arith.constant dense<0.000000e+00> : vector<3x16x8xf32>
    %206 = tpu.matmul %203, %205, %cst_58 {dimension_numbers = #tpu.dot_dimension_numbers<[2], [1], [1], [2], [0, 0, 0, 1, 1, 2], [0], [0]>} : vector<3x16x8xf32>, vector<3x8x8xf32>, vector<3x16x8xf32> -> vector<3x16x8xf32>
    %c0_59 = arith.constant 0 : index
    %c0_60 = arith.constant 0 : index
    %c0_61 = arith.constant 0 : index
    %207 = vector.load %arg7[%c0_59, %c0_60, %c0_61] : memref<1x8x8xf32, #tpu.memory_space<vmem>>, vector<1x8x8xf32>
    %208 = vector.shape_cast %207 : vector<1x8x8xf32> to vector<8x8xf32>
    %cst_62 = arith.constant dense<0.000000e+00> : vector<16x8xf32>
    %209 = tpu.matmul %189, %208, %cst_62 {dimension_numbers = #tpu.dot_dimension_numbers<[1], [0], [0], [1], [0, 0, 1, 1], [], []>} : vector<16x8xf32>, vector<8x8xf32>, vector<16x8xf32> -> vector<16x8xf32>
    %c0_63 = arith.constant 0 : index
    %c0_64 = arith.constant 0 : index
    %c0_65 = arith.constant 0 : index
    %210 = vector.load %arg8[%c0_63, %c0_64, %c0_65] : memref<1x1x8xf32, #tpu.memory_space<vmem>>, vector<1x1x8xf32>
    %211 = vector.shape_cast %210 : vector<1x1x8xf32> to vector<1x8xf32>
    %212 = vector.broadcast %211 : vector<1x8xf32> to vector<16x8xf32>
    %213 = arith.addf %209, %212 : vector<16x8xf32>
    %cst_66 = arith.constant dense<0.000000e+00> : vector<16x8xf32>
    %214 = vector.multi_reduction <add>, %206, %cst_66 [0] : vector<3x16x8xf32> to vector<16x8xf32>
    %215 = arith.addf %213, %214 : vector<16x8xf32>
    %216 = arith.mulf %215, %200 : vector<16x8xf32>
    %217 = math.tanh %216 : vector<16x8xf32>
    %c0_67 = arith.constant 0 : index
    %c8 = arith.constant 8 : index
    %218 = vector.load %arg12[%c0_67, %c8] : memref<16x24xf32, #tpu.memory_space<vmem>>, vector<16x8xf32>
    tpu.vector_store %arg12[%c0_67, %c8], %217 {strides = array<i32>} : memref<16x24xf32, #tpu.memory_space<vmem>>, vector<16x8xf32>,
    %c0_68 = arith.constant 0 : index
    %c0_69 = arith.constant 0 : index
    %219 = vector.load %arg5[%c0_68, %c0_69] : memref<48x16xf32, #tpu.memory_space<vmem>>, vector<48x16xf32>
    %cst_70 = arith.constant dense<0.000000e+00> : vector<48x8xf32>
    %220 = tpu.matmul %219, %217, %cst_70 {dimension_numbers = #tpu.dot_dimension_numbers<[1], [0], [0], [1], [0, 0, 1, 1], [], []>} : vector<48x16xf32>, vector<16x8xf32>, vector<48x8xf32> -> vector<48x8xf32>
    %221 = vector.shape_cast %220 : vector<48x8xf32> to vector<3x16x8xf32>
    %c0_71 = arith.constant 0 : index
    %c0_72 = arith.constant 0 : index
    %c0_73 = arith.constant 0 : index
    %222 = vector.load %arg9[%c0_71, %c0_72, %c0_73] : memref<3x8x8xf32, #tpu.memory_space<vmem>>, vector<3x8x8xf32>
    %cst_74 = arith.constant dense<0.000000e+00> : vector<3x16x8xf32>
    %223 = tpu.matmul %221, %222, %cst_74 {dimension_numbers = #tpu.dot_dimension_numbers<[2], [1], [1], [2], [0, 0, 0, 1, 1, 2], [0], [0]>} : vector<3x16x8xf32>, vector<3x8x8xf32>, vector<3x16x8xf32> -> vector<3x16x8xf32>
    %c0_75 = arith.constant 0 : index
    %c0_76 = arith.constant 0 : index
    %224 = vector.load %arg10[%c0_75, %c0_76] : memref<8x8xf32, #tpu.memory_space<vmem>>, vector<8x8xf32>
    %cst_77 = arith.constant dense<0.000000e+00> : vector<16x8xf32>
    %225 = tpu.matmul %217, %224, %cst_77 {dimension_numbers = #tpu.dot_dimension_numbers<[1], [0], [0], [1], [0, 0, 1, 1], [], []>} : vector<16x8xf32>, vector<8x8xf32>, vector<16x8xf32> -> vector<16x8xf32>
    %c0_78 = arith.constant 0 : index
    %c0_79 = arith.constant 0 : index
    %226 = vector.load %arg11[%c0_78, %c0_79] : memref<1x8xf32, #tpu.memory_space<vmem>>, vector<1x8xf32>
    %227 = vector.broadcast %226 : vector<1x8xf32> to vector<16x8xf32>
    %228 = arith.addf %225, %227 : vector<16x8xf32>
    %cst_80 = arith.constant dense<0.000000e+00> : vector<16x8xf32>
    %229 = vector.multi_reduction <add>, %223, %cst_80 [0] : vector<3x16x8xf32> to vector<16x8xf32>
    %230 = arith.addf %228, %229 : vector<16x8xf32>
    %c0_81 = arith.constant 0 : index
    %c16 = arith.constant 16 : index
    %231 = vector.load %arg12[%c0_81, %c16] : memref<16x24xf32, #tpu.memory_space<vmem>>, vector<16x8xf32>
    tpu.vector_store %arg12[%c0_81, %c16], %230 {strides = array<i32>} : memref<16x24xf32, #tpu.memory_space<vmem>>, vector<16x8xf32>,
    return
  }
}

</mosaic_0001>

<bundles_post_ra>
// kernel: tpu_custom_call.1
= control target key start
LH: loop header
LB: loop body
LE: loop exit
PB: predicated region body
PF: predicated region fallthrough
CT: control target
= control target key end

     0   :  { %17 = vsyncpa [#allocation4], 0  ;;  %s2954_s0 = inlined_call_operand.vmem [shape: f32[8,8,8], index: 0, kind: input, shape index: {}]   ;;  %s2955_s1 = inlined_call_operand.hbm [shape: f32[8,32], index: 1, kind: input, shape index: {}]   ;;  %s2956_s2 = inlined_call_operand.hbm [shape: f32[8,32], index: 2, kind: input, shape index: {}]   ;;  %s2957_s3 = inlined_call_operand.vmem [shape: f32[1,32], index: 3, kind: input, shape index: {}]   ;;  %s2958_s4 = inlined_call_operand.vmem [shape: f32[16,8], index: 4, kind: input, shape index: {}]   ;;  %s2959_s5 = inlined_call_operand.vmem [shape: f32[48,16], index: 5, kind: input, shape index: {}]   ;;  %s2960_s6 = inlined_call_operand.vmem [shape: f32[3,8,8], index: 6, kind: input, shape index: {}]   ;;  %s2961_s7 = inlined_call_operand.hbm [shape: f32[1,8,8], index: 7, kind: input, shape index: {}]   ;;  %s2962_s8 = inlined_call_operand.vmem [shape: f32[1,1,8], index: 8, kind: input, shape index: {}]   ;;  %s2963_s9 = inlined_call_operand.vmem [shape: f32[3,8,8], index: 9, kind: input, shape index: {}]   ;;  %s2964_s10 = inlined_call_operand.vmem [shape: f32[8,8], index: 10, kind: input, shape index: {}]   ;;  %s2965_s11 = inlined_call_operand.vmem [shape: f32[1,8], index: 11, kind: input, shape index: {}]   ;;  %s2966_s12 = inlined_call_operand.hbm [shape: f32[16,24], index: 12, kind: output, shape index: {}]  }
   0x1   :  { %18 = vsyncpa [#allocation7], 0 }
   0x2   :  { %19 = vsyncpa [#allocation5], 0  ;;  %s2575_s21 = smov [#allocation6]   ;;  %s2576_s23 = smov [#allocation3]  }
   0x3   :  { %s38_s22 = sshll.u32 %s2575_s21, 4  ;;  %s28_s24 = sshll.u32 %s2576_s23, 4  ;;  %s39_s22 = int_to_ptr.vmem [resolvable:$true] %s38_s22  ;;  %s29_s24 = int_to_ptr.vmem [resolvable:$true] %s28_s24 }
   0x4   :  { %s2481_s27 = scalar_lea.hbm %s2956_s2, 128 }
   0x5   :  { %p2482_p0 = scmp.ne.s32.totalorder %s2956_s2, %s2481_s27  ;;  %p2485_p1 = scmp.lt.u32.totalorder %s2481_s27, %s2956_s2 }
   0x7   :  { %p2487_p2 = pnand %p2485_p1, %p2482_p0 }
   0x9   :  { %2490 = shalt.err (!%p2487_p2)
}
   0xa   :  { %s2491_s14 = scalar_lea.vmem %s39_s22, 128  ;;  %p2496_p4 = scmp.lt.s32.totalorder %s39_s22, %s39_s22 }
   0xb   :  { %p2492_p3 = scmp.ne.s32.totalorder %s39_s22, %s2491_s14  ;;  %p2497_p5 = scmp.lt.s32.totalorder %s2491_s14, %s2491_s14 }
   0xd   :  { %p2498_p6 = por %p2497_p5, %p2496_p4 }
   0xf   :  { %p2499_p7 = pnand %p2498_p6, %p2492_p3 }
  0x11   :  { %2502 = shalt.err (!%p2499_p7)
}
  0x12   :  { %41 = dma.hbm_to_vmem [thread:$0]  %s2956_s2, 128, %s39_s22, [#allocation7]  }
  0x13   :  { %s2503_s19 = scalar_lea.hbm %s2955_s1, 128 }
  0x14   :  { %p2504_p8 = scmp.ne.s32.totalorder %s2955_s1, %s2503_s19  ;;  %p2507_p9 = scmp.lt.u32.totalorder %s2503_s19, %s2955_s1 }
  0x16   :  { %p2509_p10 = pnand %p2507_p9, %p2504_p8 }
  0x18   :  { %2512 = shalt.err (!%p2509_p10)
}
  0x19   :  { %s2513_s26 = scalar_lea.vmem %s29_s24, 128  ;;  %p2518_p12 = scmp.lt.s32.totalorder %s29_s24, %s29_s24 }
  0x1a   :  { %p2514_p11 = scmp.ne.s32.totalorder %s29_s24, %s2513_s26  ;;  %p2519_p13 = scmp.lt.s32.totalorder %s2513_s26, %s2513_s26 }
  0x1c   :  { %p2520_p0 = por %p2519_p13, %p2518_p12 }
  0x1e   :  { %p2521_p1 = pnand %p2520_p0, %p2514_p11 }
  0x20   :  { %2524 = shalt.err (!%p2521_p1)
}
  0x21   :  { %31 = dma.hbm_to_vmem [thread:$0]  %s2955_s1, 128, %s29_s24, [#allocation4]  }
  0x22   :  { %s2577_s27 = smov [#allocation8]   ;;  %s2525_s13 = scalar_lea.hbm %s2961_s7, 128 }
  0x23   :  { %s56_s28 = sshll.u32 %s2577_s27, 4  ;;  %p2526_p2 = scmp.ne.s32.totalorder %s2961_s7, %s2525_s13  ;;  %s57_s28 = int_to_ptr.vmem [resolvable:$true] %s56_s28 }
  0x24   :  { %p2529_p3 = scmp.lt.u32.totalorder %s2525_s13, %s2961_s7 }
  0x26   :  { %p2531_p4 = pnand %p2529_p3, %p2526_p2 }
  0x28   :  { %2534 = shalt.err (!%p2531_p4)
}
  0x29   :  { %s2535_s18 = scalar_lea.vmem %s57_s28, 128  ;;  %p2540_p6 = scmp.lt.s32.totalorder %s57_s28, %s57_s28 }
  0x2a   :  { %p2536_p5 = scmp.ne.s32.totalorder %s57_s28, %s2535_s18  ;;  %p2541_p7 = scmp.lt.s32.totalorder %s2535_s18, %s2535_s18 }
  0x2c   :  { %p2542_p8 = por %p2541_p7, %p2540_p6 }
  0x2e   :  { %p2543_p9 = pnand %p2542_p8, %p2536_p5 }
  0x30   :  { %2546 = shalt.err (!%p2543_p9)
}
  0x31   :  { %59 = dma.hbm_to_vmem [thread:$0]  %s2961_s7, 128, %s57_s28, [#allocation7]  }
  0x32   :  { %2569 = dma.done.wait [#allocation4], 128  }
  0x33   :  { %2570 = vsyncadd [#allocation4], 4294967168 }
  0x34   :  { %2571 = dma.done.wait [#allocation7], 256  }
  0x35   :  { %2572 = vsyncadd [#allocation7], 4294967040  ;;  %v2578_v0 = vmov 0.0   ;;  %vm2579_vm0 = vmmov 0   ;;  %vm93_vm1 = vcmask 64512   ;;  %v85_v1 = vld [vmem:[#allocation3] sm:$0xff] }
  0x36   :  { %2275 = vmatprep.subr.mxu1 %v2578_v0  ;;  %2277 = vmatprep.mubr.msk.f32.mxu1 %vm2579_vm0, %v2578_v0  ;;  %v77_v2 = vld [vmem:[%s2954_s0] sm:$0xff]  ;;  %v78_v3 = vld [vmem:[%s2954_s0 + $0x8] sm:$0xff]  ;;  %vm223_vm2 = vcmask 261120   ;;  %s2580_s26 = smov 104   ;;  %s2582_s2 = smov 112   ;;  %v79_v42 = vld [vmem:[%s2954_s0 + $0x10] sm:$0xff] }
  0x37   :  { %2261 = vmatprep.subr.mxu0 %v85_v1  ;;  %2263 = vmatprep.mubr.msk.f32.mxu0 %vm93_vm1, %v77_v2  ;;  %v2697_v4 = vld [vmem:[#allocation6] sm:$0xff]  ;;  %v2713_v5 = vld [vmem:[%s2957_s3] ss:$0 sm:$0xff]  ;;  %s2581_s3 = smov 8   ;;  %v80_v43 = vld [vmem:[%s2954_s0 + $0x18] sm:$0xff]  ;;  %vm1171_vm3 = vcmask 130048  }
  0x38   :  { %2262 = vmatpush3.msra.mxu0 %v85_v1  ;;  %2276 = vmatpush3.msra.mxu1 %v2697_v4  ;;  %vm1640_vm4 = vcmask 130112   ;;  %s2583_s7 = smov 16   ;;  %vm2115_vm5 = vcmask 195712  }
  0x39   :  { %2264 = vmatmul.mubr.msk.f32.vlgmr.msra.gmra.mrb[0].mxu0 %vm93_vm1, %v78_v3  ;;  %2278 = vmatmul.mubr.f32.vlgmr.msra.gmra.mrb[0].mxu1 %v2578_v0 }
  0x3a   :  { %2280 = vmatprep.subr.mxu1 %v2578_v0  ;;  %2282 = vmatprep.mubr.msk.f32.mxu1 %vm2579_vm0, %v2578_v0 }
  0x3b   :  { %2281 = vmatpush3.msra.mxu1 %v2697_v4  ;;  %2295 = vmatprep.subr.mxu0 %v2578_v0 }
  0x3c   :  { %2285 = vmatprep.subr.mxu1 %v2578_v0  ;;  %2296 = vmatpush3.msra.mxu0 %v2697_v4 }
  0x3d   :  { %2305 = vmatprep.subr.mxu0 %v2578_v0  ;;  %2266 = vmatprep.mubr.msk.f32.mxu0 %vm93_vm1, %v79_v42 }
  0x3e   :  { %2267 = vmatmul.mubr.msk.f32.gmra.mrb[2].mxu0 %vm93_vm1, %v80_v43 }
 0x10c   :  { %v2265_v6 = vpop.f32.mrb[0].mxu0  ;;  %v303_v7 = vpop.f32.mrb[0].mxu1 }
 0x10d   :  { %v190_v8 = vadd.f32 %v2265_v6, %v2713_v5  ;;  %v184_v9 = vpop.f32.mrb[1].mxu0  ;;  %v2279_v10 = vpop.f32.mrb[1].mxu1 }
 0x10e   :  { %v185_v11 = vadd.f32 %v2713_v5, %v184_v9 }
 0x10f   :  { %225 = vst.msk [vmem:[#allocation2 + $0x8] sm:$0xff] %vm223_vm2, %v190_v8 }
 0x110   :  { %224 = vst.msk [vmem:[#allocation2] sm:$0xff] %vm223_vm2, %v185_v11 }
 0x111   :  { %v2268_v47 = vpop.f32.mrb[2].mxu0 }
 0x112   :  { %v200_v48 = vadd.f32 %v2268_v47, %v2713_v5  ;;  %v194_v49 = vpop.f32.mrb[3].mxu0 }
 0x113   :  { %v195_v50 = vadd.f32 %v2713_v5, %v194_v49 }
 0x114   :  { %227 = vst.msk [vmem:[#allocation2 + $0x18] sm:$0xff] %vm223_vm2, %v200_v48 }
 0x115   :  { %226 = vst.msk [vmem:[#allocation2 + $0x10] sm:$0xff] %vm223_vm2, %v195_v50 }
 0x116   :  { %v334_v28 = vld [vmem:[#allocation2 + $0x8] sm:$0xff] }
 0x117   :  { %v233_v12 = vld [vmem:[#allocation2] sm:$0xff] }
 0x118   :  { %v307_v13 = vadd.f32 %v303_v7, %v233_v12 }
 0x11a   :  { %2405 = vtanh.f32 %v307_v13  ;;  %v2145_v15 = vmul.f32 -1.442695, %v307_v13 }
 0x11b   :  { %v540_v11 = vld [vmem:[#allocation2 + $0x18] sm:$0xff] }
 0x11c   :  { %2407 = vpow2.f32 %v2145_v15  ;;  %v437_v52 = vld [vmem:[#allocation2 + $0x10] sm:$0xff] }
 0x124   :  { %v2406_v14 = vpop.eup %2405 }
 0x125   :  { %317 = vrot.lane.b32.xlu0 %v2406_v14, %s2580_s26 }
 0x126   :  { %v2408_v16 = vpop.eup %2407 }
 0x127   :  { %v311_v17 = vadd.f32 1.0, %v2408_v16 }
 0x129   :  { %2409 = vrcp.f32 %v311_v17 }
 0x133   :  { %v2410_v18 = vpop.eup %2409 }
 0x134   :  { %v315_v21 = vmul.f32 0.0, %v2410_v18 }
 0x197   :  { %v318_v19 = vpop.permute.xlu0 %317 }
 0x198   :  { %v320_v20 = vmul.f32 %v2410_v18, %v318_v19 }
 0x19a   :  { %322 = vrot.lane.b32.xlu0 %v320_v20, %s2581_s3 }
 0x20c   :  { %v323_v22 = vpop.permute.xlu0 %322 }
 0x20d   :  { %v325_v23 = vadd.f32 %v323_v22, %v315_v21 }
 0x20f   :  { %2411 = vtanh.f32 %v325_v23 }
 0x219   :  { %v2412_v24 = vpop.eup %2411 }
 0x21a   :  { %328 = vrot.lane.b32.xlu1 %v2412_v24, %s2581_s3 }
 0x28c   :  { %v329_v25 = vpop.permute.xlu1 %328 }
 0x28d   :  { %v2722_v26 = vmul.f32 %v2410_v18, %v329_v25  ;;  %v81_v25 = vld [vmem:[%s2954_s0 + $0x20] sm:$0xff] }
 0x28e   :  { %2269 = vmatprep.mubr.msk.f32.mxu0 %vm93_vm1, %v81_v25 }
 0x28f   :  { %336 = vrot.lane.b32.xlu1 %v2722_v26, %s2582_s2 }
 0x301   :  { %v337_v27 = vpop.permute.xlu1 %336 }
 0x302   :  { %2283 = vmatmul.mubr.msk.f32.vlgmr.msra.gmra.mrb[2].mxu1 %vm93_vm1, %v337_v27  ;;  %v83_v27 = vld [vmem:[%s2954_s0 + $0x30] sm:$0xff] }
 0x303   :  { %2286 = vmatpush3.msra.mxu1 %v2697_v4  ;;  %2287 = vmatprep.mubr.msk.f32.mxu1 %vm2579_vm0, %v2578_v0 }
 0x304   :  { %2290 = vmatprep.subr.mxu1 %v2578_v0 }
 0x3d5   :  { %v406_v29 = vpop.f32.mrb[2].mxu1 }
 0x3d6   :  { %v410_v30 = vadd.f32 %v406_v29, %v334_v28  ;;  %v2284_v31 = vpop.f32.mrb[3].mxu1  ;;  %v84_v28 = vld [vmem:[%s2954_s0 + $0x38] sm:$0xff] }
 0x3d8   :  { %2413 = vtanh.f32 %v410_v30  ;;  %v2147_v33 = vmul.f32 -1.442695, %v410_v30 }
 0x3da   :  { %2415 = vpow2.f32 %v2147_v33 }
 0x3e2   :  { %v2414_v32 = vpop.eup %2413 }
 0x3e3   :  { %420 = vrot.lane.b32.xlu0 %v2414_v32, %s2580_s26 }
 0x3e4   :  { %v2416_v34 = vpop.eup %2415 }
 0x3e5   :  { %v414_v35 = vadd.f32 1.0, %v2416_v34 }
 0x3e7   :  { %2417 = vrcp.f32 %v414_v35 }
 0x3f1   :  { %v2418_v36 = vpop.eup %2417 }
 0x3f2   :  { %v418_v39 = vmul.f32 %v2418_v36, %v325_v23 }
 0x455   :  { %v421_v37 = vpop.permute.xlu0 %420 }
 0x456   :  { %v423_v38 = vmul.f32 %v2418_v36, %v421_v37 }
 0x458   :  { %425 = vrot.lane.b32.xlu1 %v423_v38, %s2581_s3 }
 0x4ca   :  { %v426_v40 = vpop.permute.xlu1 %425 }
 0x4cb   :  { %v428_v41 = vadd.f32 %v426_v40, %v418_v39 }
 0x4cd   :  { %2419 = vtanh.f32 %v428_v41 }
 0x4d7   :  { %v2420_v44 = vpop.eup %2419 }
 0x4d8   :  { %431 = vrot.lane.b32.xlu0 %v2420_v44, %s2581_s3 }
 0x54a   :  { %v432_v45 = vpop.permute.xlu0 %431 }
 0x54b   :  { %v434_v46 = vmul.f32 %v2418_v36, %v432_v45 }
 0x54d   :  { %439 = vrot.lane.b32.xlu1 %v434_v46, %s2582_s2  ;;  %v435_v7 = vadd.f32 %v434_v46, %v2722_v26  ;;  %v82_v26 = vld [vmem:[%s2954_s0 + $0x28] sm:$0xff] }
 0x54e   :  { %2270 = vmatmul.mubr.msk.f32.gmra.mrb[4].mxu0 %vm93_vm1, %v82_v26 }
 0x54f   :  { %2272 = vmatprep.mubr.msk.f32.mxu0 %vm93_vm1, %v83_v27 }
 0x552   :  { %2273 = vmatmul.mubr.msk.f32.gmra.mrb[6].mxu0 %vm93_vm1, %v84_v28 }
 0x553   :  { %2297 = vmatprep.mubr.msk.f32.mxu0 %vm2579_vm0, %v2578_v0 }
 0x5bf   :  { %v440_v51 = vpop.permute.xlu1 %439 }
 0x5c0   :  { %2288 = vmatmul.mubr.msk.f32.vlgmr.msra.gmra.mrb[4].mxu1 %vm93_vm1, %v440_v51 }
 0x5c1   :  { %2291 = vmatpush3.msra.mxu1 %v2697_v4  ;;  %2292 = vmatprep.mubr.msk.f32.mxu1 %vm2579_vm0, %v2578_v0 }
 0x5c2   :  { %2300 = vmatprep.subr.mxu1 %v2578_v0 }
 0x621   :  { %v2271_v33 = vpop.f32.mrb[4].mxu0 }
 0x622   :  { %v210_v34 = vadd.f32 %v2271_v33, %v2713_v5  ;;  %v204_v35 = vpop.f32.mrb[5].mxu0 }
 0x623   :  { %v205_v36 = vadd.f32 %v2713_v5, %v204_v35 }
 0x624   :  { %229 = vst.msk [vmem:[#allocation2 + $0x28] sm:$0xff] %vm223_vm2, %v210_v34 }
 0x625   :  { %228 = vst.msk [vmem:[#allocation2 + $0x20] sm:$0xff] %vm223_vm2, %v205_v36  ;;  %v2274_v37 = vpop.f32.mrb[6].mxu0 }
 0x626   :  { %v220_v38 = vadd.f32 %v2274_v37, %v2713_v5  ;;  %v214_v39 = vpop.f32.mrb[7].mxu0 }
 0x627   :  { %v215_v40 = vadd.f32 %v2713_v5, %v214_v39 }
 0x628   :  { %231 = vst.msk [vmem:[#allocation2 + $0x38] sm:$0xff] %vm223_vm2, %v220_v38 }
 0x629   :  { %230 = vst.msk [vmem:[#allocation2 + $0x30] sm:$0xff] %vm223_vm2, %v215_v40 }
 0x62c   :  { %v643_v42 = vld [vmem:[#allocation2 + $0x20] sm:$0xff] }
 0x62f   :  { %v952_v35 = vld [vmem:[#allocation2 + $0x38] sm:$0xff] }
 0x693   :  { %v509_v53 = vpop.f32.mrb[4].mxu1 }
 0x694   :  { %v513_v54 = vadd.f32 %v509_v53, %v437_v52  ;;  %v2289_v55 = vpop.f32.mrb[5].mxu1 }
 0x696   :  { %2421 = vtanh.f32 %v513_v54  ;;  %v2149_v57 = vmul.f32 -1.442695, %v513_v54 }
 0x698   :  { %2423 = vpow2.f32 %v2149_v57 }
 0x6a0   :  { %v2422_v56 = vpop.eup %2421 }
 0x6a1   :  { %523 = vrot.lane.b32.xlu0 %v2422_v56, %s2580_s26 }
 0x6a2   :  { %v2424_v58 = vpop.eup %2423 }
 0x6a3   :  { %v517_v59 = vadd.f32 1.0, %v2424_v58 }
 0x6a5   :  { %2425 = vrcp.f32 %v517_v59 }
 0x6af   :  { %v2426_v60 = vpop.eup %2425 }
 0x6b0   :  { %v521_v63 = vmul.f32 %v2426_v60, %v428_v41 }
 0x713   :  { %v524_v61 = vpop.permute.xlu0 %523 }
 0x714   :  { %v526_v62 = vmul.f32 %v2426_v60, %v524_v61 }
 0x716   :  { %528 = vrot.lane.b32.xlu1 %v526_v62, %s2581_s3 }
 0x788   :  { %v529_v1 = vpop.permute.xlu1 %528 }
 0x789   :  { %v531_v2 = vadd.f32 %v529_v1, %v521_v63 }
 0x78b   :  { %2427 = vtanh.f32 %v531_v2 }
 0x795   :  { %v2428_v3 = vpop.eup %2427 }
 0x796   :  { %534 = vrot.lane.b32.xlu0 %v2428_v3, %s2581_s3 }
 0x808   :  { %v535_v6 = vpop.permute.xlu0 %534 }
 0x809   :  { %v537_v8 = vmul.f32 %v2426_v60, %v535_v6  ;;  %v746_v60 = vld [vmem:[#allocation2 + $0x28] sm:$0xff] }
 0x80b   :  { %v538_v9 = vadd.f32 %v537_v8, %v435_v7  ;;  %542 = vrot.lane.b32.xlu1 %v537_v8, %s2582_s2 }
 0x87d   :  { %v543_v10 = vpop.permute.xlu1 %542 }
 0x87e   :  { %2293 = vmatmul.mubr.msk.f32.vlgmr.msra.gmra.mrb[6].mxu1 %vm93_vm1, %v543_v10 }
 0x87f   :  { %2301 = vmatpush3.msra.mxu1 %v2697_v4  ;;  %2302 = vmatprep.mubr.msk.f32.mxu1 %vm2579_vm0, %v2578_v0 }
 0x880   :  { %2310 = vmatprep.subr.mxu1 %v2578_v0 }
 0x951   :  { %v612_v12 = vpop.f32.mrb[6].mxu1 }
 0x952   :  { %v616_v13 = vadd.f32 %v612_v12, %v540_v11  ;;  %v2294_v14 = vpop.f32.mrb[7].mxu1 }
 0x954   :  { %2429 = vtanh.f32 %v616_v13  ;;  %v2151_v16 = vmul.f32 -1.442695, %v616_v13 }
 0x956   :  { %2431 = vpow2.f32 %v2151_v16  ;;  %v849_v16 = vld [vmem:[#allocation2 + $0x30] sm:$0xff] }
 0x95e   :  { %v2430_v15 = vpop.eup %2429 }
 0x95f   :  { %626 = vrot.lane.b32.xlu0 %v2430_v15, %s2580_s26 }
 0x960   :  { %v2432_v17 = vpop.eup %2431 }
 0x961   :  { %v620_v18 = vadd.f32 1.0, %v2432_v17 }
 0x963   :  { %2433 = vrcp.f32 %v620_v18 }
 0x96d   :  { %v2434_v19 = vpop.eup %2433 }
 0x96e   :  { %v624_v22 = vmul.f32 %v2434_v19, %v531_v2 }
 0x9d1   :  { %v627_v20 = vpop.permute.xlu0 %626 }
 0x9d2   :  { %v629_v21 = vmul.f32 %v2434_v19, %v627_v20 }
 0x9d4   :  { %631 = vrot.lane.b32.xlu1 %v629_v21, %s2581_s3 }
 0xa46   :  { %v632_v23 = vpop.permute.xlu1 %631 }
 0xa47   :  { %v634_v24 = vadd.f32 %v632_v23, %v624_v22 }
 0xa49   :  { %2435 = vtanh.f32 %v634_v24 }
 0xa53   :  { %v2436_v29 = vpop.eup %2435 }
 0xa54   :  { %637 = vrot.lane.b32.xlu0 %v2436_v29, %s2581_s3 }
 0xac6   :  { %v638_v30 = vpop.permute.xlu0 %637 }
 0xac7   :  { %v640_v31 = vmul.f32 %v2434_v19, %v638_v30 }
 0xac9   :  { %v641_v32 = vadd.f32 %v640_v31, %v538_v9  ;;  %645 = vrot.lane.b32.xlu1 %v640_v31, %s2582_s2 }
 0xb3b   :  { %v646_v41 = vpop.permute.xlu1 %645 }
 0xb3c   :  { %2298 = vmatmul.mubr.msk.f32.vlgmr.msra.gmra.mrb[8].mxu0 %vm93_vm1, %v646_v41 }
 0xb3d   :  { %2306 = vmatpush3.msra.mxu0 %v2697_v4  ;;  %2307 = vmatprep.mubr.msk.f32.mxu0 %vm2579_vm0, %v2578_v0 }
 0xc0f   :  { %v715_v43 = vpop.f32.mrb[8].mxu0 }
 0xc10   :  { %v719_v44 = vadd.f32 %v715_v43, %v643_v42  ;;  %v2299_v45 = vpop.f32.mrb[9].mxu0 }
 0xc12   :  { %2437 = vtanh.f32 %v719_v44  ;;  %v2153_v5 = vmul.f32 -1.442695, %v719_v44 }
 0xc14   :  { %2439 = vpow2.f32 %v2153_v5 }
 0xc1c   :  { %v2438_v46 = vpop.eup %2437 }
 0xc1d   :  { %729 = vrot.lane.b32.xlu0 %v2438_v46, %s2580_s26 }
 0xc1e   :  { %v2440_v47 = vpop.eup %2439 }
 0xc1f   :  { %v723_v48 = vadd.f32 1.0, %v2440_v47 }
 0xc21   :  { %2441 = vrcp.f32 %v723_v48 }
 0xc2b   :  { %v2442_v49 = vpop.eup %2441 }
 0xc2c   :  { %v727_v52 = vmul.f32 %v2442_v49, %v634_v24 }
 0xc8f   :  { %v730_v50 = vpop.permute.xlu0 %729 }
 0xc90   :  { %v732_v51 = vmul.f32 %v2442_v49, %v730_v50  ;;  %v1056_v50 = vld [vmem:[%s2958_s4 + $0x8] sm:$0xff] }
 0xc91   :  { %1286 = vst.msk [vmem:[#allocation9 + $0x8] sm:$0xff] %vm93_vm1, %v1056_v50 }
 0xc92   :  { %734 = vrot.lane.b32.xlu1 %v732_v51, %s2581_s3 }
 0xd04   :  { %v735_v53 = vpop.permute.xlu1 %734 }
 0xd05   :  { %v737_v54 = vadd.f32 %v735_v53, %v727_v52  ;;  %v1165_v52 = vld [vmem:[%s2959_s5] sm:$0xff] }
 0xd07   :  { %2443 = vtanh.f32 %v737_v54 }
 0xd11   :  { %v2444_v55 = vpop.eup %2443 }
 0xd12   :  { %740 = vrot.lane.b32.xlu0 %v2444_v55, %s2581_s3  ;;  %v2833_v55 = vld [vmem:[%s2959_s5 + $0x8] sm:$0xff] }
 0xd84   :  { %v741_v56 = vpop.permute.xlu0 %740 }
 0xd85   :  { %v743_v57 = vmul.f32 %v2442_v49, %v741_v56  ;;  %v1055_v49 = vld [vmem:[%s2958_s4] sm:$0xff]  ;;  %v2838_v56 = vld [vmem:[%s2959_s5 + $0x10] sm:$0xff]  ;;  %s2584_s4 = smov [#allocation9]  }
 0xd86   :  { %1285 = vst.msk [vmem:[#allocation9] sm:$0xff] %vm93_vm1, %v1055_v49  ;;  %v2386_v51 = vpack.c.bf16 %v1056_v50, %v1055_v49 }
 0xd87   :  { %v744_v58 = vadd.f32 %v743_v57, %v641_v32  ;;  %748 = vrot.lane.b32.xlu1 %v743_v57, %s2582_s2 }
 0xdf9   :  { %v749_v59 = vpop.permute.xlu1 %748 }
 0xdfa   :  { %2303 = vmatmul.mubr.msk.f32.vlgmr.msra.gmra.mrb[8].mxu1 %vm93_vm1, %v749_v59  ;;  %v2847_v59 = vld [vmem:[%s2959_s5 + $0x18] sm:$0xff] }
 0xdfb   :  { %2311 = vmatpush3.msra.mxu1 %v2697_v4  ;;  %2312 = vmatprep.mubr.msk.f32.mxu1 %vm2579_vm0, %v2578_v0 }
 0xdfc   :  { %2387 = vmatprep.subr.bf16.mxu1 %v2386_v51 }
 0xecd   :  { %v818_v61 = vpop.f32.mrb[8].mxu1 }
 0xece   :  { %v822_v62 = vadd.f32 %v818_v61, %v746_v60  ;;  %v2304_v63 = vpop.f32.mrb[9].mxu1  ;;  %v2852_v60 = vld [vmem:[%s2959_s5 + $0x20] sm:$0xff]  ;;  %v2862_v61 = vld [vmem:[%s2959_s5 + $0x28] sm:$0xff] }
 0xecf   :  { %v1287_v63 = vld [vmem:[%s2960_s6] sm:$0xff] }
 0xed0   :  { %2445 = vtanh.f32 %v822_v62  ;;  %v2155_v2 = vmul.f32 -1.442695, %v822_v62 }
 0xed2   :  { %2447 = vpow2.f32 %v2155_v2  ;;  %v1533_v2 = vld [vmem:[#allocation8] sm:$0xff] }
 0xeda   :  { %v2446_v1 = vpop.eup %2445 }
 0xedb   :  { %832 = vrot.lane.b32.xlu0 %v2446_v1, %s2580_s26  ;;  %v1288_v1 = vld [vmem:[%s2960_s6 + $0x8] sm:$0xff] }
 0xedc   :  { %v2448_v3 = vpop.eup %2447 }
 0xedd   :  { %v826_v6 = vadd.f32 1.0, %v2448_v3 }
 0xedf   :  { %2449 = vrcp.f32 %v826_v6 }
 0xee9   :  { %v2450_v7 = vpop.eup %2449 }
 0xeea   :  { %v830_v4 = vmul.f32 %v2450_v7, %v737_v54 }
 0xf4d   :  { %v833_v8 = vpop.permute.xlu0 %832 }
 0xf4e   :  { %v835_v9 = vmul.f32 %v2450_v7, %v833_v8 }
 0xf50   :  { %837 = vrot.lane.b32.xlu1 %v835_v9, %s2581_s3 }
 0xfc2   :  { %v838_v0 = vpop.permute.xlu1 %837 }
 0xfc3   :  { %v840_v10 = vadd.f32 %v838_v0, %v830_v4 }
 0xfc5   :  { %2451 = vtanh.f32 %v840_v10 }
 0xfcf   :  { %v2452_v11 = vpop.eup %2451 }
 0xfd0   :  { %843 = vrot.lane.b32.xlu0 %v2452_v11, %s2581_s3 }
0x1042   :  { %v844_v12 = vpop.permute.xlu0 %843 }
0x1043   :  { %v846_v13 = vmul.f32 %v2450_v7, %v844_v12  ;;  %v1289_v7 = vld [vmem:[%s2960_s6 + $0x10] sm:$0xff] }
0x1045   :  { %v847_v14 = vadd.f32 %v846_v13, %v744_v58  ;;  %851 = vrot.lane.b32.xlu1 %v846_v13, %s2582_s2 }
0x10b7   :  { %v852_v15 = vpop.permute.xlu1 %851 }
0x10b8   :  { %2308 = vmatmul.mubr.msk.f32.vlgmr.msra.gmra.mrb[10].mxu0 %vm93_vm1, %v852_v15 }
0x10b9   :  { %2317 = vmatprep.mubr.msk.f32.mxu0 %vm93_vm1, %v1055_v49 }
0x118b   :  { %v921_v17 = vpop.f32.mrb[10].mxu0 }
0x118c   :  { %v925_v18 = vadd.f32 %v921_v17, %v849_v16  ;;  %v2309_v19 = vpop.f32.mrb[11].mxu0 }
0x118e   :  { %2453 = vtanh.f32 %v925_v18  ;;  %v2157_v21 = vmul.f32 -1.442695, %v925_v18 }
0x1190   :  { %2455 = vpow2.f32 %v2157_v21 }
0x1198   :  { %v2454_v20 = vpop.eup %2453 }
0x1199   :  { %935 = vrot.lane.b32.xlu0 %v2454_v20, %s2580_s26 }
0x119a   :  { %v2456_v22 = vpop.eup %2455 }
0x119b   :  { %v929_v23 = vadd.f32 1.0, %v2456_v22 }
0x119d   :  { %2457 = vrcp.f32 %v929_v23 }
0x11a7   :  { %v2458_v24 = vpop.eup %2457 }
0x11a8   :  { %v933_v27 = vmul.f32 %v2458_v24, %v840_v10 }
0x120b   :  { %v936_v25 = vpop.permute.xlu0 %935 }
0x120c   :  { %v938_v26 = vmul.f32 %v2458_v24, %v936_v25 }
0x120e   :  { %940 = vrot.lane.b32.xlu1 %v938_v26, %s2581_s3 }
0x1280   :  { %v941_v28 = vpop.permute.xlu1 %940 }
0x1281   :  { %v943_v29 = vadd.f32 %v941_v28, %v933_v27 }
0x1283   :  { %2459 = vtanh.f32 %v943_v29 }
0x128d   :  { %v2460_v30 = vpop.eup %2459 }
0x128e   :  { %946 = vrot.lane.b32.xlu0 %v2460_v30, %s2581_s3 }
0x1300   :  { %v947_v31 = vpop.permute.xlu0 %946 }
0x1301   :  { %v949_v32 = vmul.f32 %v2458_v24, %v947_v31 }
0x1303   :  { %v950_v33 = vadd.f32 %v949_v32, %v847_v14  ;;  %954 = vrot.lane.b32.xlu1 %v949_v32, %s2582_s2  ;;  %v2175_v32 = vld [vmem:[%s2962_s8] ss:$0 sm:$0xff] }
0x1375   :  { %v955_v34 = vpop.permute.xlu1 %954 }
0x1376   :  { %2313 = vmatmul.mubr.msk.f32.vlgmr.msra.gmra.mrb[10].mxu1 %vm93_vm1, %v955_v34 }
0x1377   :  { %2324 = vmatprep.mubr.msk.f32.mxu1 %vm1171_vm3, %v1165_v52  ;;  %2389 = vmatpush3.bf16.msra.mxu1 %v2386_v51 }
0x1378   :  { %2348 = vmatprep.subr.mxu1 %v1533_v2 }
0x137a   :  { %2325 = vmatmul.mubr.msk.f32.vlgmr.msra.gmra.mrb[12].mxu1 %vm1171_vm3, %v2833_v55 }
0x137b   :  { %2327 = vmatprep.mubr.msk.f32.mxu1 %vm1171_vm3, %v2838_v56  ;;  %2349 = vmatpush3.msra.mxu1 %v1533_v2 }
0x137e   :  { %2328 = vmatmul.mubr.msk.f32.gmra.mrb[14].mxu1 %vm1171_vm3, %v2847_v59 }
0x137f   :  { %2330 = vmatprep.mubr.msk.f32.mxu1 %vm1171_vm3, %v2852_v60 }
0x1382   :  { %2331 = vmatmul.mubr.msk.f32.gmra.mrb[16].mxu1 %vm1171_vm3, %v2862_v61 }
0x1383   :  { %2350 = vmatprep.mubr.msk.f32.mxu1 %vm93_vm1, %v1055_v49 }
0x1386   :  { %2351 = vmatmul.mubr.msk.f32.vlgmr.msra.gmra.mrb[18].mxu1 %vm93_vm1, %v1056_v50 }
0x1449   :  { %v1024_v36 = vpop.f32.mrb[10].mxu1 }
0x144a   :  { %v1028_v37 = vadd.f32 %v1024_v36, %v952_v35  ;;  %v2314_v38 = vpop.f32.mrb[11].mxu1 }
0x144c   :  { %2461 = vtanh.f32 %v1028_v37  ;;  %v2159_v40 = vmul.f32 -1.442695, %v1028_v37 }
0x144d   :  { %v2326_v3 = vpop.f32.mrb[12].mxu1 }
0x144e   :  { %2463 = vpow2.f32 %v2159_v40  ;;  %v1256_v6 = vpop.f32.mrb[13].mxu1 }
0x1451   :  { %v2329_v8 = vpop.f32.mrb[14].mxu1 }
0x1452   :  { %v1266_v9 = vpop.f32.mrb[15].mxu1 }
0x1455   :  { %v2332_v4 = vpop.f32.mrb[16].mxu1 }
0x1456   :  { %v2462_v39 = vpop.eup %2461  ;;  %v1276_v0 = vpop.f32.mrb[17].mxu1 }
0x1457   :  { %1038 = vrot.lane.b32.xlu0 %v2462_v39, %s2580_s26 }
0x1458   :  { %v2464_v41 = vpop.eup %2463 }
0x1459   :  { %v1032_v42 = vadd.f32 1.0, %v2464_v41  ;;  %v2352_v31 = vpop.f32.mrb[18].mxu1 }
0x145a   :  { %v1613_v36 = vadd.f32 %v2352_v31, %v2175_v32 }
0x145b   :  { %2465 = vrcp.f32 %v1032_v42  ;;  %v1607_v42 = vpop.f32.mrb[19].mxu1 }
0x1465   :  { %v2466_v43 = vpop.eup %2465 }
0x1466   :  { %v1036_v46 = vmul.f32 %v2466_v43, %v943_v29 }
0x14c9   :  { %v1039_v44 = vpop.permute.xlu0 %1038 }
0x14ca   :  { %v1041_v45 = vmul.f32 %v2466_v43, %v1039_v44  ;;  %v1608_v44 = vadd.f32 %v2175_v32, %v1607_v42 }
0x14cc   :  { %1043 = vrot.lane.b32.xlu1 %v1041_v45, %s2581_s3 }
0x153e   :  { %v1044_v5 = vpop.permute.xlu1 %1043 }
0x153f   :  { %v1046_v47 = vadd.f32 %v1044_v5, %v1036_v46 }
0x1541   :  { %2467 = vtanh.f32 %v1046_v47 }
0x154b   :  { %v2468_v48 = vpop.eup %2467 }
0x154c   :  { %1049 = vrot.lane.b32.xlu0 %v2468_v48, %s2581_s3 }
0x15be   :  { %v1050_v53 = vpop.permute.xlu0 %1049 }
0x15bf   :  { %v1052_v54 = vmul.f32 %v2466_v43, %v1050_v53 }
0x15c1   :  { %v1053_v57 = vadd.f32 %v1052_v54, %v950_v33  ;;  %v1762_v54 = vld [vmem:[%s2963_s9] sm:$0xff] }
0x15c2   :  { %2366 = vmatprep.subr.mxu1 %v1762_v54 }
0x15c3   :  { %v1054_v58 = vmul.f32 0.125, %v1053_v57  ;;  %2367 = vmatpush3.msra.mxu1 %v1762_v54 }
0x15c5   :  { %1058 = vrot.lane.b32.xlu1 %v1054_v58, %s2582_s2 }
0x1637   :  { %v1059_v62 = vpop.permute.xlu1 %1058 }
0x1638   :  { %2315 = vmatprep.subr.msk.mxu0 %vm93_vm1, %v1059_v62 }
0x1639   :  { %2316 = vmatpush3.xpose.msk.msra.mxu0 %vm93_vm1, %v1059_v62 }
0x163a   :  { %2333 = vmatprep.subr.mxu0 %v1287_v63 }
0x163c   :  { %2318 = vmatmul.mubr.msk.f32.vlgmr.msra.gmra.mrb[12].mxu0 %vm93_vm1, %v1056_v50 }
0x163d   :  { %2334 = vmatpush3.msra.mxu0 %v1287_v63  ;;  %2335 = vmatprep.mubr.msk.f32.mxu0 %vm93_vm1, %v1256_v6  ;;  %v2008_v63 = vld [vmem:[%s2964_s10] sm:$0xff] }
0x163e   :  { %2338 = vmatprep.subr.mxu0 %v1288_v1 }
0x1640   :  { %2336 = vmatmul.mubr.msk.f32.vlgmr.msra.gmra.mrb[14].mxu0 %vm93_vm1, %v2326_v3 }
0x1641   :  { %2339 = vmatpush3.msra.mxu0 %v1288_v1  ;;  %2340 = vmatprep.mubr.msk.f32.mxu0 %vm93_vm1, %v1266_v9 }
0x1642   :  { %2343 = vmatprep.subr.mxu0 %v1289_v7 }
0x1644   :  { %2341 = vmatmul.mubr.msk.f32.vlgmr.msra.gmra.mrb[16].mxu0 %vm93_vm1, %v2329_v8 }
0x1645   :  { %2344 = vmatpush3.msra.mxu0 %v1289_v7  ;;  %2345 = vmatprep.mubr.msk.f32.mxu0 %vm93_vm1, %v1276_v0 }
0x1648   :  { %2346 = vmatmul.mubr.msk.f32.vlgmr.msra.gmra.mrb[18].mxu0 %vm93_vm1, %v2332_v4 }
0x1649   :  { %2357 = vmatprep.mubr.msk.f32.mxu0 %vm1171_vm3, %v1165_v52 }
0x170f   :  { %v2319_v10 = vpop.f32.mrb[12].mxu0 }
0x1710   :  { %v1134_v11 = vpop.f32.mrb[13].mxu0  ;;  %v1146_v12 = vsel %vm93_vm1, %v2319_v10, -inf }
0x1711   :  { %1147 = vmax.xlane.f32.xlu1 %v1146_v12  ;;  %v1143_v13 = vsel %vm93_vm1, %v1134_v11, -inf }
0x1712   :  { %1144 = vmax.xlane.f32.xlu0 %v1143_v13 }
0x1713   :  { %v2337_v14 = vpop.f32.mrb[14].mxu0 }
0x1714   :  { %v1362_v15 = vpop.f32.mrb[15].mxu0  ;;  %v1621_v26 = vsel %vm93_vm1, %v2337_v14, 0.0 }
0x1715   :  { %v1616_v27 = vsel %vm93_vm1, %v1362_v15, 0.0 }
0x1717   :  { %v2342_v28 = vpop.f32.mrb[16].mxu0 }
0x1718   :  { %v1622_v29 = vsel %vm93_vm1, %v2342_v28, 0.0  ;;  %v1443_v30 = vpop.f32.mrb[17].mxu0 }
0x1719   :  { %v1623_v33 = vadd.f32 %v1622_v29, %v1621_v26  ;;  %v1617_v34 = vsel %vm93_vm1, %v1443_v30, 0.0 }
0x171a   :  { %v1618_v37 = vadd.f32 %v1617_v34, %v1616_v27 }
0x171b   :  { %v2347_v35 = vpop.f32.mrb[18].mxu0 }
0x171c   :  { %v1624_v38 = vsel %vm93_vm1, %v2347_v35, 0.0  ;;  %v1524_v39 = vpop.f32.mrb[19].mxu0 }
0x171d   :  { %v1625_v40 = vadd.f32 %v1624_v38, %v1623_v33  ;;  %v1619_v41 = vsel %vm93_vm1, %v1524_v39, 0.0 }
0x171e   :  { %v1620_v43 = vadd.f32 %v1619_v41, %v1618_v37 }
0x171f   :  { %v1627_v45 = vadd.f32 %v1625_v40, %v1613_v36 }
0x1720   :  { %v1626_v46 = vadd.f32 %v1620_v43, %v1608_v44 }
0x179e   :  { %v1148_v16 = vpop.xlane.xlu1 %1147 }
0x179f   :  { %v1150_v17 = vsub.f32 %v2319_v10, %v1148_v16  ;;  %v1145_v18 = vpop.xlane.xlu0 %1144 }
0x17a0   :  { %v1149_v19 = vsub.f32 %v1134_v11, %v1145_v18 }
0x17a1   :  { %v1153_v20 = vmul.f32 1.442695, %v1150_v17  ;;  %v2190_v17 = vld [vmem:[%s2965_s11] ss:$0 sm:$0xff]  ;;  %s2123_s11 = sshll.u32 %s2584_s4, 4  ;;  %s2124_s11 = int_to_ptr.vmem [resolvable:$true] %s2123_s11 }
0x17a2   :  { %v1151_v21 = vmul.f32 1.442695, %v1149_v19  ;;  %s2547_s25 = scalar_lea.vmem %s2124_s11, 256  ;;  %p2552_p11 = scmp.lt.s32.totalorder %s2124_s11, %s2124_s11 }
0x17a3   :  { %p2548_p10 = scmp.ne.s32.totalorder %s2124_s11, %s2547_s25  ;;  %p2553_p12 = scmp.lt.s32.totalorder %s2547_s25, %s2547_s25 }
0x17a4   :  { %2469 = vpow2.f32 %v1151_v21 }
0x17a5   :  { %2471 = vpow2.f32 %v1153_v20  ;;  %p2554_p13 = por %p2553_p12, %p2552_p11 }
0x17a7   :  { %p2555_p0 = pnand %p2554_p13, %p2548_p10 }
0x17ae   :  { %v2470_v22 = vpop.eup %2469 }
0x17af   :  { %v1155_v23 = vsel %vm93_vm1, %v2470_v22, 0.0  ;;  %v2472_v24 = vpop.eup %2471 }
0x17b0   :  { %1156 = vadd.xlane.f32.xlu0 %v1155_v23  ;;  %v1158_v25 = vsel %vm93_vm1, %v2472_v24, 0.0 }
0x17b4   :  { %1159 = vadd.xlane.f32.xlu0 %v1158_v25 }
0x183d   :  { %v1157_v5 = vpop.xlane.xlu0 %1156 }
0x183e   :  { %2473 = vrcp.f32 %v1157_v5 }
0x1841   :  { %v1160_v47 = vpop.xlane.xlu0 %1159 }
0x1842   :  { %2475 = vrcp.f32 %v1160_v47 }
0x1848   :  { %v2474_v48 = vpop.eup %2473 }
0x1849   :  { %v1163_v49 = vmul.f32 %v2474_v48, %v2470_v22 }
0x184b   :  { %v1628_v50 = vmul.f32 %v1626_v46, %v1163_v49 }
0x184c   :  { %v2476_v51 = vpop.eup %2475 }
0x184d   :  { %v1164_v52 = vmul.f32 %v2476_v51, %v2472_v24  ;;  %2477 = vtanh.f32 %v1628_v50 }
0x184f   :  { %v1629_v53 = vmul.f32 %v1627_v45, %v1164_v52 }
0x1851   :  { %2479 = vtanh.f32 %v1629_v53 }
0x1857   :  { %v2478_v57 = vpop.eup %2477 }
0x1858   :  { %1634 = vrot.lane.b32.xlu1 %v2478_v57, %s2581_s3 }
0x185b   :  { %v2480_v58 = vpop.eup %2479 }
0x185c   :  { %1636 = vrot.lane.b32.xlu0 %v2480_v58, %s2581_s3  ;;  %v2390_v62 = vpack.c.bf16 %v2480_v58, %v2478_v57 }
0x185e   :  { %2391 = vmatprep.subr.bf16.mxu0 %v2390_v62 }
0x185f   :  { %2393 = vmatpush3.bf16.msra.mxu0 %v2390_v62 }
0x1860   :  { %2381 = vmatprep.subr.mxu0 %v2008_v63 }
0x1862   :  { %2358 = vmatmul.mubr.msk.f32.vlgmr.msra.gmra.mrb[20].mxu0 %vm1171_vm3, %v2833_v55  ;;  %v1763_v55 = vld [vmem:[%s2963_s9 + $0x8] sm:$0xff] }
0x1863   :  { %2360 = vmatprep.mubr.msk.f32.mxu0 %vm1171_vm3, %v2838_v56  ;;  %2382 = vmatpush3.msra.mxu0 %v2008_v63 }
0x1864   :  { %2371 = vmatprep.subr.mxu1 %v1763_v55 }
0x1866   :  { %2361 = vmatmul.mubr.msk.f32.gmra.mrb[22].mxu0 %vm1171_vm3, %v2847_v59 }
0x1867   :  { %2363 = vmatprep.mubr.msk.f32.mxu0 %vm1171_vm3, %v2852_v60  ;;  %v1764_v60 = vld [vmem:[%s2963_s9 + $0x10] sm:$0xff] }
0x186a   :  { %2364 = vmatmul.mubr.msk.f32.gmra.mrb[24].mxu0 %vm1171_vm3, %v2862_v61 }
0x186b   :  { %2383 = vmatprep.mubr.msk.f32.mxu0 %vm93_vm1, %v2478_v57 }
0x186e   :  { %2384 = vmatmul.mubr.msk.f32.vlgmr.msra.gmra.mrb[26].mxu0 %vm93_vm1, %v2480_v58 }
0x18ca   :  { %v1635_v56 = vpop.permute.xlu1 %1634 }
0x18cb   :  { %1641 = vst.msk [vmem:[#allocation9] sm:$0xff] %vm1640_vm4, %v1635_v56 }
0x18ce   :  { %v1637_v1 = vpop.permute.xlu0 %1636 }
0x18cf   :  { %1642 = vst.msk [vmem:[#allocation9 + $0x8] sm:$0xff] %vm1640_vm4, %v1637_v1 }
0x1935   :  { %v2359_v59 = vpop.f32.mrb[20].mxu0 }
0x1936   :  { %v1733_v2 = vpop.f32.mrb[21].mxu0 }
0x1937   :  { %2368 = vmatprep.mubr.msk.f32.mxu1 %vm93_vm1, %v1733_v2 }
0x1938   :  { %2369 = vmatmul.mubr.msk.f32.vlgmr.msra.gmra.mrb[20].mxu1 %vm93_vm1, %v2359_v59 }
0x1939   :  { %v2362_v61 = vpop.f32.mrb[22].mxu0  ;;  %2372 = vmatpush3.msra.mxu1 %v1763_v55 }
0x193a   :  { %v1743_v3 = vpop.f32.mrb[23].mxu0  ;;  %2376 = vmatprep.subr.mxu1 %v1764_v60 }
0x193b   :  { %2373 = vmatprep.mubr.msk.f32.mxu1 %vm93_vm1, %v1743_v3 }
0x193c   :  { %2374 = vmatmul.mubr.msk.f32.vlgmr.msra.gmra.mrb[22].mxu1 %vm93_vm1, %v2362_v61 }
0x193d   :  { %v2365_v6 = vpop.f32.mrb[24].mxu0  ;;  %2377 = vmatpush3.msra.mxu1 %v1764_v60 }
0x193e   :  { %v1753_v7 = vpop.f32.mrb[25].mxu0 }
0x193f   :  { %2378 = vmatprep.mubr.msk.f32.mxu1 %vm93_vm1, %v1753_v7 }
0x1940   :  { %2379 = vmatmul.mubr.msk.f32.vlgmr.msra.gmra.mrb[24].mxu1 %vm93_vm1, %v2365_v6 }
0x1941   :  { %v2385_v8 = vpop.f32.mrb[26].mxu0 }
0x1942   :  { %v2086_v9 = vpop.f32.mrb[27].mxu0  ;;  %v2092_v22 = vadd.f32 %v2385_v8, %v2190_v17 }
0x1943   :  { %v2087_v25 = vadd.f32 %v2190_v17, %v2086_v9 }
0x1a0b   :  { %v2370_v4 = vpop.f32.mrb[20].mxu1 }
0x1a0c   :  { %v1837_v0 = vpop.f32.mrb[21].mxu1  ;;  %v2100_v11 = vsel %vm93_vm1, %v2370_v4, 0.0 }
0x1a0d   :  { %v2095_v14 = vsel %vm93_vm1, %v1837_v0, 0.0 }
0x1a0f   :  { %v2375_v10 = vpop.f32.mrb[22].mxu1 }
0x1a10   :  { %v2101_v12 = vsel %vm93_vm1, %v2375_v10, 0.0  ;;  %v1918_v13 = vpop.f32.mrb[23].mxu1 }
0x1a11   :  { %v2102_v15 = vadd.f32 %v2101_v12, %v2100_v11  ;;  %v2096_v16 = vsel %vm93_vm1, %v1918_v13, 0.0 }
0x1a12   :  { %v2097_v18 = vadd.f32 %v2096_v16, %v2095_v14 }
0x1a13   :  { %v2380_v19 = vpop.f32.mrb[24].mxu1 }
0x1a14   :  { %v2103_v20 = vsel %vm93_vm1, %v2380_v19, 0.0  ;;  %v1999_v21 = vpop.f32.mrb[25].mxu1 }
0x1a15   :  { %v2104_v23 = vadd.f32 %v2103_v20, %v2102_v15  ;;  %v2098_v24 = vsel %vm93_vm1, %v1999_v21, 0.0 }
0x1a16   :  { %v2099_v26 = vadd.f32 %v2098_v24, %v2097_v18 }
0x1a17   :  { %v2106_v27 = vadd.f32 %v2104_v23, %v2092_v22 }
0x1a18   :  { %v2105_v28 = vadd.f32 %v2099_v26, %v2087_v25 }
0x1a1a   :  { %2109 = vrot.lane.b32.xlu1 %v2105_v28, %s2583_s7 }
0x1a1e   :  { %2111 = vrot.lane.b32.xlu1 %v2106_v27, %s2583_s7 }
0x1a8c   :  { %v2110_v29 = vpop.permute.xlu1 %2109 }
0x1a8d   :  { %2116 = vst.msk [vmem:[#allocation9] sm:$0xff] %vm2115_vm5, %v2110_v29 }
0x1a90   :  { %v2112_v30 = vpop.permute.xlu1 %2111 }
0x1a91   :  { %2117 = vst.msk [vmem:[#allocation9 + $0x8] sm:$0xff] %vm2115_vm5, %v2112_v30 }
0x1a92   :  { %2558 = shalt.err (!%p2555_p0)
}
0x1a93   :  { %s2559_s27 = scalar_lea.hbm %s2966_s12, 256 }
0x1a94   :  { %p2560_p1 = scmp.ne.s32.totalorder %s2966_s12, %s2559_s27  ;;  %p2563_p2 = scmp.lt.u32.totalorder %s2559_s27, %s2966_s12 }
0x1a96   :  { %p2565_p3 = pnand %p2563_p2, %p2560_p1 }
0x1a98   :  { %2568 = shalt.err (!%p2565_p3)
}
0x1a99   :  { %s2585_s2 = smov 128  }
0x1a9a   :  { %2129 = dma.vmem_to_hbm [thread:$0]  %s2124_s11, 256, %s2966_s12, [#allocation5], %s2585_s2, %s2585_s2, %s2581_s3  }
0x1a9b   :  { %2573 = dma.done.wait [#allocation5], 256  }
0x1a9c   :  { %2574 = vsyncadd [#allocation5], 4294967040 }
0x1a9d   :  { %2133 = vsyncpa [#allocation4], 1 }
0x1a9e   :  { %2134 = vsyncpa [#allocation7], 1 }
0x1a9f   :  { %2135 = vsyncpa [#allocation5], 1 }

</bundles_post_ra>
